<compile_context>
chip_gen: v7x
topology: tpu7x:2x2x1
jax: 0.10.0
libtpu: 0.0.40
codegen_flags: <defaults>
</compile_context>

<pallas_src>
import jax
import jax.numpy as jnp
from jax.experimental import pallas as pl
from jax.experimental.pallas import tpu as pltpu


def _cdiv(a, b):
    return -(-a // b)


def _round_up(a, b):
    return _cdiv(a, b) * b


# ----------------------------- fused Encoder kernel ---------------------------
def encoder_kernel(x_ref, wih_ref, whh_ref, bl_ref,
                   w1_ref, b1_ref, w2_ref, b2_ref, w3_ref, b3_ref,
                   out_ref, gx_sc, hseq_sc):
    """Fused LSTM + MCGBlock (2 CG blocks, 'max' pooling) for one batch tile.

    x_ref:   (T, Bb, Din)  input, time-major (Bb = batch tile, multiple of 8)
    wih_ref: (Din, 4H) bf16, whh_ref: (H, 4H) bf16, bl_ref: (1, 4H) f32
             (g-gate columns [2H:3H) are pre-scaled by 2 for the sigmoid trick)
    w{1,2,3}_ref / b{1,2,3}_ref: stacked MLP weights, leading axis of size 4:
        k=0: block1 s_mlp, k=1: block1 c_mlp, k=2: block2 s_mlp, k=3: block2 c_mlp
    out_ref: (Bb, H)  final running-mean c
    gx_sc:   (T, Bb, 4H) f32 scratch  — staged input projection
    hseq_sc: (T, Bb, H)  bf16 scratch — LSTM output sequence
    """
    T, Bb, Din = x_ref.shape
    H = whh_ref.shape[0]

    # ---------------- LSTM ----------------
    # Hoisted input projection: one (T*Bb, Din) x (Din, 4H) matmul, staged
    # into VMEM scratch so it never lives as a giant traced value.
    x = x_ref[...].reshape(T * Bb, Din).astype(jnp.bfloat16)
    gx = jnp.dot(x, wih_ref[...], preferred_element_type=jnp.float32) + bl_ref[...]
    gx_sc[...] = gx.reshape(T, Bb, 4 * H)

    whh = whh_ref[...]                                    # (H, 4H) bf16
    h = jnp.zeros((Bb, H), jnp.float32)
    c = jnp.zeros((Bb, H), jnp.float32)

    # Static unroll over time (T small & static).  Gate order: [i, f, g, o].
    # One full-4H sigmoid per step; tanh of the g-gate is recovered as
    # 2*sigmoid(2x) - 1 (g columns of the weights pre-scaled by 2 at init).
    for t in range(T):
        gates = gx_sc[t] + jnp.dot(h.astype(jnp.bfloat16), whh,
                                   preferred_element_type=jnp.float32)
        sg = jax.nn.sigmoid(gates)                        # single EUP push, 4H lanes
        i_g = sg[:, 0:H]
        f_g = sg[:, H:2 * H]
        g_g = 2.0 * sg[:, 2 * H:3 * H] - 1.0              # == tanh(pre-scaled gate)
        o_g = sg[:, 3 * H:4 * H]
        c = f_g * c + i_g * g_g
        h = o_g * jnp.tanh(c)                             # only H-wide tanh remains
        hseq_sc[t] = h.astype(jnp.bfloat16)               # stays in VMEM

    s0 = hseq_sc[...].reshape(T * Bb, H)                  # bf16, time-major rows

    # ---------------- MCGBlock ----------------
    def mlp3(v, k):
        # Linear+BN(eval,folded)+ReLU, Linear+BN+ReLU, Linear — bf16 MXU, f32 acc.
        v = jnp.maximum(jnp.dot(v.astype(jnp.bfloat16), w1_ref[k],
                                preferred_element_type=jnp.float32) + b1_ref[k], 0.0)
        v = jnp.maximum(jnp.dot(v.astype(jnp.bfloat16), w2_ref[k],
                                preferred_element_type=jnp.float32) + b2_ref[k], 0.0)
        v = jnp.dot(v.astype(jnp.bfloat16), w3_ref[k],
                    preferred_element_type=jnp.float32) + b3_ref[k]
        return v

    def cg_block(s_flat, c_in, ks, kc):
        c_new = mlp3(c_in, kc)                            # (Bb, H)
        s_new = mlp3(s_flat, ks)                          # (T*Bb, H) one matmul chain
        s_g3 = s_new.reshape(T, Bb, H) * c_new[None, :, :]
        agg = jnp.max(s_g3, axis=0)                       # 'max' pooling over time
        return s_g3.reshape(T * Bb, H), agg

    rm_s = s0.astype(jnp.float32)
    rm_c = jnp.ones((Bb, H), jnp.float32)

    # Block 1 (i = 1)
    s1, c1 = cg_block(s0, rm_c, 0, 1)
    rm_s = (rm_s + s1) * 0.5
    rm_c = (rm_c + c1) * 0.5

    # Block 2 (i = 2).  rm_s after this block is dead (only rm_c is returned),
    # so its update / writeback is skipped entirely.
    _s2, c2 = cg_block(rm_s, rm_c, 2, 3)
    rm_c = (rm_c * 2.0 + c2) / 3.0

    out_ref[...] = rm_c.astype(out_ref.dtype)


# ----------------------------- wrapper -----------------------------------------
def _full_spec(a):
    nd = a.ndim
    return pl.BlockSpec(a.shape, lambda i, _nd=nd: (0,) * _nd)


def _choose_tiling(B, T, Din, H, vmem_budget_bytes=12 << 20, row_cap=512):
    """Pick a sublane-aligned batch tile that fits the VMEM budget and keeps
    >= 2 grid programs when the batch allows it (v7x megacore)."""
    B8 = _round_up(B, 8)
    per_row = (2 * T * Din * 4          # double-buffered x tile (f32)
               + T * 4 * H * 4          # gx scratch (f32)
               + T * H * 2              # hseq scratch (bf16)
               + 8 * T * 2 * H * 4)     # conservative MLP-chain temporaries (f32)
    max_rows = max(8, min(row_cap, (vmem_budget_bytes // per_row) // 8 * 8))
    if B8 <= max_rows:
        n_tiles = 2 if B8 >= 16 else 1
    else:
        n_tiles = _cdiv(B8, max_rows)
    b_tile = _round_up(_cdiv(B8, n_tiles), 8)
    b_pad = n_tiles * b_tile
    return b_tile, b_pad, n_tiles


@jax.jit
def encoder_forward(params, x):
    B, T, Din = x.shape
    H = params["whh"].shape[0]

    b_tile, B_pad, n_tiles = _choose_tiling(B, T, Din, H)

    # Pad batch to a multiple of the tile and go time-major in HBM (free-ish
    # XLA ops) so all in-kernel collapses are sublane-aligned and contiguous.
    if B_pad != B:
        x = jnp.pad(x, ((0, B_pad - B), (0, 0), (0, 0)))
    x_tm = jnp.transpose(x, (1, 0, 2))                    # (T, B_pad, Din)

    weight_args = (params["wih"], params["whh"], params["b"],
                   params["W1"], params["B1"], params["W2"], params["B2"],
                   params["W3"], params["B3"])

    out = pl.pallas_call(
        encoder_kernel,
        out_shape=jax.ShapeDtypeStruct((B_pad, H), jnp.float32),
        grid=(n_tiles,),
        in_specs=[pl.BlockSpec((T, b_tile, Din), lambda i: (0, i, 0))]
                 + [_full_spec(a) for a in weight_args],
        out_specs=pl.BlockSpec((b_tile, H), lambda i: (i, 0)),
        scratch_shapes=[pltpu.VMEM((T, b_tile, 4 * H), jnp.float32),
                        pltpu.VMEM((T, b_tile, H), jnp.bfloat16)],
        compiler_params=pltpu.CompilerParams(
            dimension_semantics=("parallel",),
            vmem_limit_bytes=32 * 1024 * 1024),
    )(x_tm, *weight_args)
    return out[:B]


# ----------------------------- parameter setup --------------------------------
def _fold_bn(w, b, gamma, beta, mean, var, eps=1e-5):
    """Fold eval-mode BatchNorm1d into the preceding Linear (x @ w + b)."""
    scale = gamma / jnp.sqrt(var + eps)
    return w * scale[None, :], (b - mean) * scale + beta


def init_encoder_params(key, dim_in, dim_hidden):
    H = dim_hidden
    keys = iter(jax.random.split(key, 64))

    def u(shape, fan_in):
        bound = 1.0 / float(fan_in) ** 0.5
        return jax.random.uniform(next(keys), shape, jnp.float32, -bound, bound)

    params = {}
    # LSTM weights stored (in, out) so the kernel does x @ W directly.
    # Gate order [i, f, g, o]; the g-gate columns are pre-scaled by 2 so the
    # kernel can use tanh(x) = 2*sigmoid(2x) - 1 with a single sigmoid push.
    wih = u((dim_in, 4 * H), H)
    whh = u((H, 4 * H), H)
    b = u((1, 4 * H), H) + u((1, 4 * H), H)               # b_ih + b_hh
    gscale = jnp.concatenate([jnp.ones((2 * H,), jnp.float32),
                              jnp.full((H,), 2.0, jnp.float32),
                              jnp.ones((H,), jnp.float32)])
    params["wih"] = (wih * gscale[None, :]).astype(jnp.bfloat16)
    params["whh"] = (whh * gscale[None, :]).astype(jnp.bfloat16)
    params["b"] = b * gscale[None, :]                     # f32

    # MLP weights for 2 CG blocks x (s_mlp, c_mlp), dims [H, 2H, 2H, H],
    # stacked along a leading axis of size 4 (block1_s, block1_c, block2_s, block2_c).
    dims = [H, 2 * H, 2 * H, H]
    Ws = [[], [], []]
    Bs = [[], [], []]
    for _blk in range(2):
        for _name in ("s", "c"):
            for li in range(3):
                din, dout = dims[li], dims[li + 1]
                w = u((din, dout), din)
                bb = u((dout,), din)
                if li < 2:  # BatchNorm after layers 1 and 2 (default init, eval mode)
                    gamma = jnp.ones((dout,), jnp.float32)
                    beta = jnp.zeros((dout,), jnp.float32)
                    mean = jnp.zeros((dout,), jnp.float32)
                    var = jnp.ones((dout,), jnp.float32)
                    w, bb = _fold_bn(w, bb, gamma, beta, mean, var)
                Ws[li].append(w)
                Bs[li].append(bb.reshape(1, -1))
    params["W1"] = jnp.stack(Ws[0]).astype(jnp.bfloat16)   # (4, H, 2H)
    params["B1"] = jnp.stack(Bs[0])                        # (4, 1, 2H) f32
    params["W2"] = jnp.stack(Ws[1]).astype(jnp.bfloat16)   # (4, 2H, 2H)
    params["B2"] = jnp.stack(Bs[1])                        # (4, 1, 2H) f32
    params["W3"] = jnp.stack(Ws[2]).astype(jnp.bfloat16)   # (4, 2H, H)
    params["B3"] = jnp.stack(Bs[2])                        # (4, 1, H) f32
    return params


# ----------------------------- demo --------------------------------------------
if __name__ == "__main__":
    key = jax.random.PRNGKey(0)
    dim_in, dim_hidden = 4, 32
    B, T = 2, 8

    pkey, xkey = jax.random.split(key)
    params = init_encoder_params(pkey, dim_in, dim_hidden)
    x = jax.random.normal(xkey, (B, T, dim_in), jnp.float32)

    out = encoder_forward(params, x)
    out = jax.block_until_ready(out)

    assert out.shape == (B, dim_hidden), out.shape
    assert bool(jnp.isfinite(out).all())
    print("KERNEL_OK")
</pallas_src>

<mosaic_0001>
module attributes {stable_mosaic.version = 11 : i64} {
  func.func @encoder_kernel(%arg0: i32, %arg1: memref<8x8x4xf32, #tpu.memory_space<vmem>>, %arg2: memref<4x128xbf16, #tpu.memory_space<vmem>>, %arg3: memref<32x128xbf16, #tpu.memory_space<vmem>>, %arg4: memref<1x128xf32, #tpu.memory_space<vmem>>, %arg5: memref<4x32x64xbf16, #tpu.memory_space<vmem>>, %arg6: memref<4x1x64xf32, #tpu.memory_space<vmem>>, %arg7: memref<4x64x64xbf16, #tpu.memory_space<vmem>>, %arg8: memref<4x1x64xf32, #tpu.memory_space<vmem>>, %arg9: memref<4x64x32xbf16, #tpu.memory_space<vmem>>, %arg10: memref<4x1x32xf32, #tpu.memory_space<vmem>>, %arg11: memref<8x32xf32, #tpu.memory_space<vmem>>, %arg12: memref<8x8x128xf32, #tpu.memory_space<vmem>>, %arg13: memref<8x8x32xbf16, #tpu.memory_space<vmem>>) attributes {dimension_semantics = [#tpu.dimension_semantics<parallel>], iteration_bounds = array<i64: 1>, scalar_prefetch = 0 : i64, scratch_operands = 2 : i64, tpu.core_type = #tpu.core_type<tc>, window_params = [{transform_indices = @transform_0, window_bounds = array<i64: 8, 8, 4>}, {pipeline_mode = #tpu.pipeline_mode<synchronous>, transform_indices = @transform_1, window_bounds = array<i64: 4, 128>}, {pipeline_mode = #tpu.pipeline_mode<synchronous>, transform_indices = @transform_2, window_bounds = array<i64: 32, 128>}, {pipeline_mode = #tpu.pipeline_mode<synchronous>, transform_indices = @transform_3, window_bounds = array<i64: 1, 128>}, {pipeline_mode = #tpu.pipeline_mode<synchronous>, transform_indices = @transform_4, window_bounds = array<i64: 4, 32, 64>}, {pipeline_mode = #tpu.pipeline_mode<synchronous>, transform_indices = @transform_5, window_bounds = array<i64: 4, 1, 64>}, {pipeline_mode = #tpu.pipeline_mode<synchronous>, transform_indices = @transform_6, window_bounds = array<i64: 4, 64, 64>}, {pipeline_mode = #tpu.pipeline_mode<synchronous>, transform_indices = @transform_7, window_bounds = array<i64: 4, 1, 64>}, {pipeline_mode = #tpu.pipeline_mode<synchronous>, transform_indices = @transform_8, window_bounds = array<i64: 4, 64, 32>}, {pipeline_mode = #tpu.pipeline_mode<synchronous>, transform_indices = @transform_9, window_bounds = array<i64: 4, 1, 32>}, {transform_indices = @transform_10, window_bounds = array<i64: 8, 32>}]} {
    %c0 = arith.constant 0 : index
    %c0_0 = arith.constant 0 : index
    %c0_1 = arith.constant 0 : index
    %0 = vector.load %arg1[%c0, %c0_0, %c0_1] : memref<8x8x4xf32, #tpu.memory_space<vmem>>, vector<8x8x4xf32>
    %1 = vector.shape_cast %0 : vector<8x8x4xf32> to vector<64x4xf32>
    %2 = arith.truncf %1 : vector<64x4xf32> to vector<64x4xbf16>
    %c0_2 = arith.constant 0 : index
    %c0_3 = arith.constant 0 : index
    %3 = vector.load %arg2[%c0_2, %c0_3] : memref<4x128xbf16, #tpu.memory_space<vmem>>, vector<4x128xbf16>
    %cst = arith.constant dense<0.000000e+00> : vector<64x128xf32>
    %4 = tpu.matmul %2, %3, %cst {dimension_numbers = #tpu.dot_dimension_numbers<[1], [0], [0], [1], [0, 0, 1, 1], [], []>} : vector<64x4xbf16>, vector<4x128xbf16>, vector<64x128xf32> -> vector<64x128xf32>
    %c0_4 = arith.constant 0 : index
    %c0_5 = arith.constant 0 : index
    %5 = vector.load %arg4[%c0_4, %c0_5] : memref<1x128xf32, #tpu.memory_space<vmem>>, vector<1x128xf32>
    %6 = vector.broadcast %5 : vector<1x128xf32> to vector<64x128xf32>
    %7 = arith.addf %4, %6 : vector<64x128xf32>
    %8 = vector.shape_cast %7 : vector<64x128xf32> to vector<8x8x128xf32>
    %c0_6 = arith.constant 0 : index
    %c0_7 = arith.constant 0 : index
    %c0_8 = arith.constant 0 : index
    %9 = vector.load %arg12[%c0_6, %c0_7, %c0_8] : memref<8x8x128xf32, #tpu.memory_space<vmem>>, vector<8x8x128xf32>
    tpu.vector_store %arg12[%c0_6, %c0_7, %c0_8], %8 {strides = array<i32>} : memref<8x8x128xf32, #tpu.memory_space<vmem>>, vector<8x8x128xf32>,
    %c0_9 = arith.constant 0 : index
    %c0_10 = arith.constant 0 : index
    %10 = vector.load %arg3[%c0_9, %c0_10] : memref<32x128xbf16, #tpu.memory_space<vmem>>, vector<32x128xbf16>
    %cst_11 = arith.constant 0.000000e+00 : f32
    %11 = vector.broadcast %cst_11 : f32 to vector<8x32xf32>
    %cst_12 = arith.constant 0.000000e+00 : f32
    %12 = vector.broadcast %cst_12 : f32 to vector<8x32xf32>
    %c0_13 = arith.constant 0 : index
    %c0_14 = arith.constant 0 : index
    %c0_15 = arith.constant 0 : index
    %13 = vector.load %arg12[%c0_13, %c0_14, %c0_15] : memref<8x8x128xf32, #tpu.memory_space<vmem>>, vector<1x8x128xf32>
    %14 = vector.shape_cast %13 : vector<1x8x128xf32> to vector<8x128xf32>
    %15 = arith.truncf %11 : vector<8x32xf32> to vector<8x32xbf16>
    %cst_16 = arith.constant dense<0.000000e+00> : vector<8x128xf32>
    %16 = tpu.matmul %15, %10, %cst_16 {dimension_numbers = #tpu.dot_dimension_numbers<[1], [0], [0], [1], [0, 0, 1, 1], [], []>} : vector<8x32xbf16>, vector<32x128xbf16>, vector<8x128xf32> -> vector<8x128xf32>
    %17 = arith.addf %14, %16 : vector<8x128xf32>
    %18 = arith.negf %17 : vector<8x128xf32>
    %19 = math.exp %18 : vector<8x128xf32>
    %cst_17 = arith.constant 1.000000e+00 : f32
    %20 = vector.broadcast %cst_17 : f32 to vector<8x128xf32>
    %21 = arith.addf %20, %19 : vector<8x128xf32>
    %22 = arith.divf %20, %21 : vector<8x128xf32>
    %23 = vector.extract_strided_slice %22 {offsets = [0, 0], sizes = [8, 32], strides = [1, 1]} : vector<8x128xf32> to vector<8x32xf32>
    %24 = vector.extract_strided_slice %22 {offsets = [0, 32], sizes = [8, 32], strides = [1, 1]} : vector<8x128xf32> to vector<8x32xf32>
    %25 = vector.extract_strided_slice %22 {offsets = [0, 64], sizes = [8, 32], strides = [1, 1]} : vector<8x128xf32> to vector<8x32xf32>
    %cst_18 = arith.constant 2.000000e+00 : f32
    %26 = vector.broadcast %cst_18 : f32 to vector<8x32xf32>
    %27 = arith.mulf %26, %25 : vector<8x32xf32>
    %cst_19 = arith.constant 1.000000e+00 : f32
    %28 = vector.broadcast %cst_19 : f32 to vector<8x32xf32>
    %29 = arith.subf %27, %28 : vector<8x32xf32>
    %30 = vector.extract_strided_slice %22 {offsets = [0, 96], sizes = [8, 32], strides = [1, 1]} : vector<8x128xf32> to vector<8x32xf32>
    %31 = arith.mulf %24, %12 : vector<8x32xf32>
    %32 = arith.mulf %23, %29 : vector<8x32xf32>
    %33 = arith.addf %31, %32 : vector<8x32xf32>
    %34 = math.tanh %33 : vector<8x32xf32>
    %35 = arith.mulf %30, %34 : vector<8x32xf32>
    %36 = arith.truncf %35 : vector<8x32xf32> to vector<8x32xbf16>
    %c0_20 = arith.constant 0 : index
    %c0_21 = arith.constant 0 : index
    %c0_22 = arith.constant 0 : index
    %37 = vector.load %arg13[%c0_20, %c0_21, %c0_22] : memref<8x8x32xbf16, #tpu.memory_space<vmem>>, vector<1x8x32xbf16>
    %38 = vector.shape_cast %37 : vector<1x8x32xbf16> to vector<8x32xbf16>
    %39 = vector.shape_cast %36 : vector<8x32xbf16> to vector<1x8x32xbf16>
    tpu.vector_store %arg13[%c0_20, %c0_21, %c0_22], %39 {strides = array<i32>} : memref<8x8x32xbf16, #tpu.memory_space<vmem>>, vector<1x8x32xbf16>,
    %c1 = arith.constant 1 : index
    %c0_23 = arith.constant 0 : index
    %c0_24 = arith.constant 0 : index
    %40 = vector.load %arg12[%c1, %c0_23, %c0_24] : memref<8x8x128xf32, #tpu.memory_space<vmem>>, vector<1x8x128xf32>
    %41 = vector.shape_cast %40 : vector<1x8x128xf32> to vector<8x128xf32>
    %42 = arith.truncf %35 : vector<8x32xf32> to vector<8x32xbf16>
    %cst_25 = arith.constant dense<0.000000e+00> : vector<8x128xf32>
    %43 = tpu.matmul %42, %10, %cst_25 {dimension_numbers = #tpu.dot_dimension_numbers<[1], [0], [0], [1], [0, 0, 1, 1], [], []>} : vector<8x32xbf16>, vector<32x128xbf16>, vector<8x128xf32> -> vector<8x128xf32>
    %44 = arith.addf %41, %43 : vector<8x128xf32>
    %45 = arith.negf %44 : vector<8x128xf32>
    %46 = math.exp %45 : vector<8x128xf32>
    %cst_26 = arith.constant 1.000000e+00 : f32
    %47 = vector.broadcast %cst_26 : f32 to vector<8x128xf32>
    %48 = arith.addf %47, %46 : vector<8x128xf32>
    %49 = arith.divf %47, %48 : vector<8x128xf32>
    %50 = vector.extract_strided_slice %49 {offsets = [0, 0], sizes = [8, 32], strides = [1, 1]} : vector<8x128xf32> to vector<8x32xf32>
    %51 = vector.extract_strided_slice %49 {offsets = [0, 32], sizes = [8, 32], strides = [1, 1]} : vector<8x128xf32> to vector<8x32xf32>
    %52 = vector.extract_strided_slice %49 {offsets = [0, 64], sizes = [8, 32], strides = [1, 1]} : vector<8x128xf32> to vector<8x32xf32>
    %cst_27 = arith.constant 2.000000e+00 : f32
    %53 = vector.broadcast %cst_27 : f32 to vector<8x32xf32>
    %54 = arith.mulf %53, %52 : vector<8x32xf32>
    %cst_28 = arith.constant 1.000000e+00 : f32
    %55 = vector.broadcast %cst_28 : f32 to vector<8x32xf32>
    %56 = arith.subf %54, %55 : vector<8x32xf32>
    %57 = vector.extract_strided_slice %49 {offsets = [0, 96], sizes = [8, 32], strides = [1, 1]} : vector<8x128xf32> to vector<8x32xf32>
    %58 = arith.mulf %51, %33 : vector<8x32xf32>
    %59 = arith.mulf %50, %56 : vector<8x32xf32>
    %60 = arith.addf %58, %59 : vector<8x32xf32>
    %61 = math.tanh %60 : vector<8x32xf32>
    %62 = arith.mulf %57, %61 : vector<8x32xf32>
    %63 = arith.truncf %62 : vector<8x32xf32> to vector<8x32xbf16>
    %c1_29 = arith.constant 1 : index
    %c0_30 = arith.constant 0 : index
    %c0_31 = arith.constant 0 : index
    %64 = vector.load %arg13[%c1_29, %c0_30, %c0_31] : memref<8x8x32xbf16, #tpu.memory_space<vmem>>, vector<1x8x32xbf16>
    %65 = vector.shape_cast %64 : vector<1x8x32xbf16> to vector<8x32xbf16>
    %66 = vector.shape_cast %63 : vector<8x32xbf16> to vector<1x8x32xbf16>
    tpu.vector_store %arg13[%c1_29, %c0_30, %c0_31], %66 {strides = array<i32>} : memref<8x8x32xbf16, #tpu.memory_space<vmem>>, vector<1x8x32xbf16>,
    %c2 = arith.constant 2 : index
    %c0_32 = arith.constant 0 : index
    %c0_33 = arith.constant 0 : index
    %67 = vector.load %arg12[%c2, %c0_32, %c0_33] : memref<8x8x128xf32, #tpu.memory_space<vmem>>, vector<1x8x128xf32>
    %68 = vector.shape_cast %67 : vector<1x8x128xf32> to vector<8x128xf32>
    %69 = arith.truncf %62 : vector<8x32xf32> to vector<8x32xbf16>
    %cst_34 = arith.constant dense<0.000000e+00> : vector<8x128xf32>
    %70 = tpu.matmul %69, %10, %cst_34 {dimension_numbers = #tpu.dot_dimension_numbers<[1], [0], [0], [1], [0, 0, 1, 1], [], []>} : vector<8x32xbf16>, vector<32x128xbf16>, vector<8x128xf32> -> vector<8x128xf32>
    %71 = arith.addf %68, %70 : vector<8x128xf32>
    %72 = arith.negf %71 : vector<8x128xf32>
    %73 = math.exp %72 : vector<8x128xf32>
    %cst_35 = arith.constant 1.000000e+00 : f32
    %74 = vector.broadcast %cst_35 : f32 to vector<8x128xf32>
    %75 = arith.addf %74, %73 : vector<8x128xf32>
    %76 = arith.divf %74, %75 : vector<8x128xf32>
    %77 = vector.extract_strided_slice %76 {offsets = [0, 0], sizes = [8, 32], strides = [1, 1]} : vector<8x128xf32> to vector<8x32xf32>
    %78 = vector.extract_strided_slice %76 {offsets = [0, 32], sizes = [8, 32], strides = [1, 1]} : vector<8x128xf32> to vector<8x32xf32>
    %79 = vector.extract_strided_slice %76 {offsets = [0, 64], sizes = [8, 32], strides = [1, 1]} : vector<8x128xf32> to vector<8x32xf32>
    %cst_36 = arith.constant 2.000000e+00 : f32
    %80 = vector.broadcast %cst_36 : f32 to vector<8x32xf32>
    %81 = arith.mulf %80, %79 : vector<8x32xf32>
    %cst_37 = arith.constant 1.000000e+00 : f32
    %82 = vector.broadcast %cst_37 : f32 to vector<8x32xf32>
    %83 = arith.subf %81, %82 : vector<8x32xf32>
    %84 = vector.extract_strided_slice %76 {offsets = [0, 96], sizes = [8, 32], strides = [1, 1]} : vector<8x128xf32> to vector<8x32xf32>
    %85 = arith.mulf %78, %60 : vector<8x32xf32>
    %86 = arith.mulf %77, %83 : vector<8x32xf32>
    %87 = arith.addf %85, %86 : vector<8x32xf32>
    %88 = math.tanh %87 : vector<8x32xf32>
    %89 = arith.mulf %84, %88 : vector<8x32xf32>
    %90 = arith.truncf %89 : vector<8x32xf32> to vector<8x32xbf16>
    %c2_38 = arith.constant 2 : index
    %c0_39 = arith.constant 0 : index
    %c0_40 = arith.constant 0 : index
    %91 = vector.load %arg13[%c2_38, %c0_39, %c0_40] : memref<8x8x32xbf16, #tpu.memory_space<vmem>>, vector<1x8x32xbf16>
    %92 = vector.shape_cast %91 : vector<1x8x32xbf16> to vector<8x32xbf16>
    %93 = vector.shape_cast %90 : vector<8x32xbf16> to vector<1x8x32xbf16>
    tpu.vector_store %arg13[%c2_38, %c0_39, %c0_40], %93 {strides = array<i32>} : memref<8x8x32xbf16, #tpu.memory_space<vmem>>, vector<1x8x32xbf16>,
    %c3 = arith.constant 3 : index
    %c0_41 = arith.constant 0 : index
    %c0_42 = arith.constant 0 : index
    %94 = vector.load %arg12[%c3, %c0_41, %c0_42] : memref<8x8x128xf32, #tpu.memory_space<vmem>>, vector<1x8x128xf32>
    %95 = vector.shape_cast %94 : vector<1x8x128xf32> to vector<8x128xf32>
    %96 = arith.truncf %89 : vector<8x32xf32> to vector<8x32xbf16>
    %cst_43 = arith.constant dense<0.000000e+00> : vector<8x128xf32>
    %97 = tpu.matmul %96, %10, %cst_43 {dimension_numbers = #tpu.dot_dimension_numbers<[1], [0], [0], [1], [0, 0, 1, 1], [], []>} : vector<8x32xbf16>, vector<32x128xbf16>, vector<8x128xf32> -> vector<8x128xf32>
    %98 = arith.addf %95, %97 : vector<8x128xf32>
    %99 = arith.negf %98 : vector<8x128xf32>
    %100 = math.exp %99 : vector<8x128xf32>
    %cst_44 = arith.constant 1.000000e+00 : f32
    %101 = vector.broadcast %cst_44 : f32 to vector<8x128xf32>
    %102 = arith.addf %101, %100 : vector<8x128xf32>
    %103 = arith.divf %101, %102 : vector<8x128xf32>
    %104 = vector.extract_strided_slice %103 {offsets = [0, 0], sizes = [8, 32], strides = [1, 1]} : vector<8x128xf32> to vector<8x32xf32>
    %105 = vector.extract_strided_slice %103 {offsets = [0, 32], sizes = [8, 32], strides = [1, 1]} : vector<8x128xf32> to vector<8x32xf32>
    %106 = vector.extract_strided_slice %103 {offsets = [0, 64], sizes = [8, 32], strides = [1, 1]} : vector<8x128xf32> to vector<8x32xf32>
    %cst_45 = arith.constant 2.000000e+00 : f32
    %107 = vector.broadcast %cst_45 : f32 to vector<8x32xf32>
    %108 = arith.mulf %107, %106 : vector<8x32xf32>
    %cst_46 = arith.constant 1.000000e+00 : f32
    %109 = vector.broadcast %cst_46 : f32 to vector<8x32xf32>
    %110 = arith.subf %108, %109 : vector<8x32xf32>
    %111 = vector.extract_strided_slice %103 {offsets = [0, 96], sizes = [8, 32], strides = [1, 1]} : vector<8x128xf32> to vector<8x32xf32>
    %112 = arith.mulf %105, %87 : vector<8x32xf32>
    %113 = arith.mulf %104, %110 : vector<8x32xf32>
    %114 = arith.addf %112, %113 : vector<8x32xf32>
    %115 = math.tanh %114 : vector<8x32xf32>
    %116 = arith.mulf %111, %115 : vector<8x32xf32>
    %117 = arith.truncf %116 : vector<8x32xf32> to vector<8x32xbf16>
    %c3_47 = arith.constant 3 : index
    %c0_48 = arith.constant 0 : index
    %c0_49 = arith.constant 0 : index
    %118 = vector.load %arg13[%c3_47, %c0_48, %c0_49] : memref<8x8x32xbf16, #tpu.memory_space<vmem>>, vector<1x8x32xbf16>
    %119 = vector.shape_cast %118 : vector<1x8x32xbf16> to vector<8x32xbf16>
    %120 = vector.shape_cast %117 : vector<8x32xbf16> to vector<1x8x32xbf16>
    tpu.vector_store %arg13[%c3_47, %c0_48, %c0_49], %120 {strides = array<i32>} : memref<8x8x32xbf16, #tpu.memory_space<vmem>>, vector<1x8x32xbf16>,
    %c4 = arith.constant 4 : index
    %c0_50 = arith.constant 0 : index
    %c0_51 = arith.constant 0 : index
    %121 = vector.load %arg12[%c4, %c0_50, %c0_51] : memref<8x8x128xf32, #tpu.memory_space<vmem>>, vector<1x8x128xf32>
    %122 = vector.shape_cast %121 : vector<1x8x128xf32> to vector<8x128xf32>
    %123 = arith.truncf %116 : vector<8x32xf32> to vector<8x32xbf16>
    %cst_52 = arith.constant dense<0.000000e+00> : vector<8x128xf32>
    %124 = tpu.matmul %123, %10, %cst_52 {dimension_numbers = #tpu.dot_dimension_numbers<[1], [0], [0], [1], [0, 0, 1, 1], [], []>} : vector<8x32xbf16>, vector<32x128xbf16>, vector<8x128xf32> -> vector<8x128xf32>
    %125 = arith.addf %122, %124 : vector<8x128xf32>
    %126 = arith.negf %125 : vector<8x128xf32>
    %127 = math.exp %126 : vector<8x128xf32>
    %cst_53 = arith.constant 1.000000e+00 : f32
    %128 = vector.broadcast %cst_53 : f32 to vector<8x128xf32>
    %129 = arith.addf %128, %127 : vector<8x128xf32>
    %130 = arith.divf %128, %129 : vector<8x128xf32>
    %131 = vector.extract_strided_slice %130 {offsets = [0, 0], sizes = [8, 32], strides = [1, 1]} : vector<8x128xf32> to vector<8x32xf32>
    %132 = vector.extract_strided_slice %130 {offsets = [0, 32], sizes = [8, 32], strides = [1, 1]} : vector<8x128xf32> to vector<8x32xf32>
    %133 = vector.extract_strided_slice %130 {offsets = [0, 64], sizes = [8, 32], strides = [1, 1]} : vector<8x128xf32> to vector<8x32xf32>
    %cst_54 = arith.constant 2.000000e+00 : f32
    %134 = vector.broadcast %cst_54 : f32 to vector<8x32xf32>
    %135 = arith.mulf %134, %133 : vector<8x32xf32>
    %cst_55 = arith.constant 1.000000e+00 : f32
    %136 = vector.broadcast %cst_55 : f32 to vector<8x32xf32>
    %137 = arith.subf %135, %136 : vector<8x32xf32>
    %138 = vector.extract_strided_slice %130 {offsets = [0, 96], sizes = [8, 32], strides = [1, 1]} : vector<8x128xf32> to vector<8x32xf32>
    %139 = arith.mulf %132, %114 : vector<8x32xf32>
    %140 = arith.mulf %131, %137 : vector<8x32xf32>
    %141 = arith.addf %139, %140 : vector<8x32xf32>
    %142 = math.tanh %141 : vector<8x32xf32>
    %143 = arith.mulf %138, %142 : vector<8x32xf32>
    %144 = arith.truncf %143 : vector<8x32xf32> to vector<8x32xbf16>
    %c4_56 = arith.constant 4 : index
    %c0_57 = arith.constant 0 : index
    %c0_58 = arith.constant 0 : index
    %145 = vector.load %arg13[%c4_56, %c0_57, %c0_58] : memref<8x8x32xbf16, #tpu.memory_space<vmem>>, vector<1x8x32xbf16>
    %146 = vector.shape_cast %145 : vector<1x8x32xbf16> to vector<8x32xbf16>
    %147 = vector.shape_cast %144 : vector<8x32xbf16> to vector<1x8x32xbf16>
    tpu.vector_store %arg13[%c4_56, %c0_57, %c0_58], %147 {strides = array<i32>} : memref<8x8x32xbf16, #tpu.memory_space<vmem>>, vector<1x8x32xbf16>,
    %c5 = arith.constant 5 : index
    %c0_59 = arith.constant 0 : index
    %c0_60 = arith.constant 0 : index
    %148 = vector.load %arg12[%c5, %c0_59, %c0_60] : memref<8x8x128xf32, #tpu.memory_space<vmem>>, vector<1x8x128xf32>
    %149 = vector.shape_cast %148 : vector<1x8x128xf32> to vector<8x128xf32>
    %150 = arith.truncf %143 : vector<8x32xf32> to vector<8x32xbf16>
    %cst_61 = arith.constant dense<0.000000e+00> : vector<8x128xf32>
    %151 = tpu.matmul %150, %10, %cst_61 {dimension_numbers = #tpu.dot_dimension_numbers<[1], [0], [0], [1], [0, 0, 1, 1], [], []>} : vector<8x32xbf16>, vector<32x128xbf16>, vector<8x128xf32> -> vector<8x128xf32>
    %152 = arith.addf %149, %151 : vector<8x128xf32>
    %153 = arith.negf %152 : vector<8x128xf32>
    %154 = math.exp %153 : vector<8x128xf32>
    %cst_62 = arith.constant 1.000000e+00 : f32
    %155 = vector.broadcast %cst_62 : f32 to vector<8x128xf32>
    %156 = arith.addf %155, %154 : vector<8x128xf32>
    %157 = arith.divf %155, %156 : vector<8x128xf32>
    %158 = vector.extract_strided_slice %157 {offsets = [0, 0], sizes = [8, 32], strides = [1, 1]} : vector<8x128xf32> to vector<8x32xf32>
    %159 = vector.extract_strided_slice %157 {offsets = [0, 32], sizes = [8, 32], strides = [1, 1]} : vector<8x128xf32> to vector<8x32xf32>
    %160 = vector.extract_strided_slice %157 {offsets = [0, 64], sizes = [8, 32], strides = [1, 1]} : vector<8x128xf32> to vector<8x32xf32>
    %cst_63 = arith.constant 2.000000e+00 : f32
    %161 = vector.broadcast %cst_63 : f32 to vector<8x32xf32>
    %162 = arith.mulf %161, %160 : vector<8x32xf32>
    %cst_64 = arith.constant 1.000000e+00 : f32
    %163 = vector.broadcast %cst_64 : f32 to vector<8x32xf32>
    %164 = arith.subf %162, %163 : vector<8x32xf32>
    %165 = vector.extract_strided_slice %157 {offsets = [0, 96], sizes = [8, 32], strides = [1, 1]} : vector<8x128xf32> to vector<8x32xf32>
    %166 = arith.mulf %159, %141 : vector<8x32xf32>
    %167 = arith.mulf %158, %164 : vector<8x32xf32>
    %168 = arith.addf %166, %167 : vector<8x32xf32>
    %169 = math.tanh %168 : vector<8x32xf32>
    %170 = arith.mulf %165, %169 : vector<8x32xf32>
    %171 = arith.truncf %170 : vector<8x32xf32> to vector<8x32xbf16>
    %c5_65 = arith.constant 5 : index
    %c0_66 = arith.constant 0 : index
    %c0_67 = arith.constant 0 : index
    %172 = vector.load %arg13[%c5_65, %c0_66, %c0_67] : memref<8x8x32xbf16, #tpu.memory_space<vmem>>, vector<1x8x32xbf16>
    %173 = vector.shape_cast %172 : vector<1x8x32xbf16> to vector<8x32xbf16>
    %174 = vector.shape_cast %171 : vector<8x32xbf16> to vector<1x8x32xbf16>
    tpu.vector_store %arg13[%c5_65, %c0_66, %c0_67], %174 {strides = array<i32>} : memref<8x8x32xbf16, #tpu.memory_space<vmem>>, vector<1x8x32xbf16>,
    %c6 = arith.constant 6 : index
    %c0_68 = arith.constant 0 : index
    %c0_69 = arith.constant 0 : index
    %175 = vector.load %arg12[%c6, %c0_68, %c0_69] : memref<8x8x128xf32, #tpu.memory_space<vmem>>, vector<1x8x128xf32>
    %176 = vector.shape_cast %175 : vector<1x8x128xf32> to vector<8x128xf32>
    %177 = arith.truncf %170 : vector<8x32xf32> to vector<8x32xbf16>
    %cst_70 = arith.constant dense<0.000000e+00> : vector<8x128xf32>
    %178 = tpu.matmul %177, %10, %cst_70 {dimension_numbers = #tpu.dot_dimension_numbers<[1], [0], [0], [1], [0, 0, 1, 1], [], []>} : vector<8x32xbf16>, vector<32x128xbf16>, vector<8x128xf32> -> vector<8x128xf32>
    %179 = arith.addf %176, %178 : vector<8x128xf32>
    %180 = arith.negf %179 : vector<8x128xf32>
    %181 = math.exp %180 : vector<8x128xf32>
    %cst_71 = arith.constant 1.000000e+00 : f32
    %182 = vector.broadcast %cst_71 : f32 to vector<8x128xf32>
    %183 = arith.addf %182, %181 : vector<8x128xf32>
    %184 = arith.divf %182, %183 : vector<8x128xf32>
    %185 = vector.extract_strided_slice %184 {offsets = [0, 0], sizes = [8, 32], strides = [1, 1]} : vector<8x128xf32> to vector<8x32xf32>
    %186 = vector.extract_strided_slice %184 {offsets = [0, 32], sizes = [8, 32], strides = [1, 1]} : vector<8x128xf32> to vector<8x32xf32>
    %187 = vector.extract_strided_slice %184 {offsets = [0, 64], sizes = [8, 32], strides = [1, 1]} : vector<8x128xf32> to vector<8x32xf32>
    %cst_72 = arith.constant 2.000000e+00 : f32
    %188 = vector.broadcast %cst_72 : f32 to vector<8x32xf32>
    %189 = arith.mulf %188, %187 : vector<8x32xf32>
    %cst_73 = arith.constant 1.000000e+00 : f32
    %190 = vector.broadcast %cst_73 : f32 to vector<8x32xf32>
    %191 = arith.subf %189, %190 : vector<8x32xf32>
    %192 = vector.extract_strided_slice %184 {offsets = [0, 96], sizes = [8, 32], strides = [1, 1]} : vector<8x128xf32> to vector<8x32xf32>
    %193 = arith.mulf %186, %168 : vector<8x32xf32>
    %194 = arith.mulf %185, %191 : vector<8x32xf32>
    %195 = arith.addf %193, %194 : vector<8x32xf32>
    %196 = math.tanh %195 : vector<8x32xf32>
    %197 = arith.mulf %192, %196 : vector<8x32xf32>
    %198 = arith.truncf %197 : vector<8x32xf32> to vector<8x32xbf16>
    %c6_74 = arith.constant 6 : index
    %c0_75 = arith.constant 0 : index
    %c0_76 = arith.constant 0 : index
    %199 = vector.load %arg13[%c6_74, %c0_75, %c0_76] : memref<8x8x32xbf16, #tpu.memory_space<vmem>>, vector<1x8x32xbf16>
    %200 = vector.shape_cast %199 : vector<1x8x32xbf16> to vector<8x32xbf16>
    %201 = vector.shape_cast %198 : vector<8x32xbf16> to vector<1x8x32xbf16>
    tpu.vector_store %arg13[%c6_74, %c0_75, %c0_76], %201 {strides = array<i32>} : memref<8x8x32xbf16, #tpu.memory_space<vmem>>, vector<1x8x32xbf16>,
    %c7 = arith.constant 7 : index
    %c0_77 = arith.constant 0 : index
    %c0_78 = arith.constant 0 : index
    %202 = vector.load %arg12[%c7, %c0_77, %c0_78] : memref<8x8x128xf32, #tpu.memory_space<vmem>>, vector<1x8x128xf32>
    %203 = vector.shape_cast %202 : vector<1x8x128xf32> to vector<8x128xf32>
    %204 = arith.truncf %197 : vector<8x32xf32> to vector<8x32xbf16>
    %cst_79 = arith.constant dense<0.000000e+00> : vector<8x128xf32>
    %205 = tpu.matmul %204, %10, %cst_79 {dimension_numbers = #tpu.dot_dimension_numbers<[1], [0], [0], [1], [0, 0, 1, 1], [], []>} : vector<8x32xbf16>, vector<32x128xbf16>, vector<8x128xf32> -> vector<8x128xf32>
    %206 = arith.addf %203, %205 : vector<8x128xf32>
    %207 = arith.negf %206 : vector<8x128xf32>
    %208 = math.exp %207 : vector<8x128xf32>
    %cst_80 = arith.constant 1.000000e+00 : f32
    %209 = vector.broadcast %cst_80 : f32 to vector<8x128xf32>
    %210 = arith.addf %209, %208 : vector<8x128xf32>
    %211 = arith.divf %209, %210 : vector<8x128xf32>
    %212 = vector.extract_strided_slice %211 {offsets = [0, 0], sizes = [8, 32], strides = [1, 1]} : vector<8x128xf32> to vector<8x32xf32>
    %213 = vector.extract_strided_slice %211 {offsets = [0, 32], sizes = [8, 32], strides = [1, 1]} : vector<8x128xf32> to vector<8x32xf32>
    %214 = vector.extract_strided_slice %211 {offsets = [0, 64], sizes = [8, 32], strides = [1, 1]} : vector<8x128xf32> to vector<8x32xf32>
    %cst_81 = arith.constant 2.000000e+00 : f32
    %215 = vector.broadcast %cst_81 : f32 to vector<8x32xf32>
    %216 = arith.mulf %215, %214 : vector<8x32xf32>
    %cst_82 = arith.constant 1.000000e+00 : f32
    %217 = vector.broadcast %cst_82 : f32 to vector<8x32xf32>
    %218 = arith.subf %216, %217 : vector<8x32xf32>
    %219 = vector.extract_strided_slice %211 {offsets = [0, 96], sizes = [8, 32], strides = [1, 1]} : vector<8x128xf32> to vector<8x32xf32>
    %220 = arith.mulf %213, %195 : vector<8x32xf32>
    %221 = arith.mulf %212, %218 : vector<8x32xf32>
    %222 = arith.addf %220, %221 : vector<8x32xf32>
    %223 = math.tanh %222 : vector<8x32xf32>
    %224 = arith.mulf %219, %223 : vector<8x32xf32>
    %225 = arith.truncf %224 : vector<8x32xf32> to vector<8x32xbf16>
    %c7_83 = arith.constant 7 : index
    %c0_84 = arith.constant 0 : index
    %c0_85 = arith.constant 0 : index
    %226 = vector.load %arg13[%c7_83, %c0_84, %c0_85] : memref<8x8x32xbf16, #tpu.memory_space<vmem>>, vector<1x8x32xbf16>
    %227 = vector.shape_cast %226 : vector<1x8x32xbf16> to vector<8x32xbf16>
    %228 = vector.shape_cast %225 : vector<8x32xbf16> to vector<1x8x32xbf16>
    tpu.vector_store %arg13[%c7_83, %c0_84, %c0_85], %228 {strides = array<i32>} : memref<8x8x32xbf16, #tpu.memory_space<vmem>>, vector<1x8x32xbf16>,
    %c0_86 = arith.constant 0 : index
    %c0_87 = arith.constant 0 : index
    %c0_88 = arith.constant 0 : index
    %229 = vector.load %arg13[%c0_86, %c0_87, %c0_88] : memref<8x8x32xbf16, #tpu.memory_space<vmem>>, vector<8x8x32xbf16>
    %230 = vector.shape_cast %229 : vector<8x8x32xbf16> to vector<64x32xbf16>
    %231 = arith.extf %230 : vector<64x32xbf16> to vector<64x32xf32>
    %cst_89 = arith.constant 1.000000e+00 : f32
    %232 = vector.broadcast %cst_89 : f32 to vector<8x32xf32>
    %233 = arith.truncf %232 : vector<8x32xf32> to vector<8x32xbf16>
    %c1_90 = arith.constant 1 : index
    %c0_91 = arith.constant 0 : index
    %c0_92 = arith.constant 0 : index
    %234 = vector.load %arg5[%c1_90, %c0_91, %c0_92] : memref<4x32x64xbf16, #tpu.memory_space<vmem>>, vector<1x32x64xbf16>
    %235 = vector.shape_cast %234 : vector<1x32x64xbf16> to vector<32x64xbf16>
    %cst_93 = arith.constant dense<0.000000e+00> : vector<8x64xf32>
    %236 = tpu.matmul %233, %235, %cst_93 {dimension_numbers = #tpu.dot_dimension_numbers<[1], [0], [0], [1], [0, 0, 1, 1], [], []>} : vector<8x32xbf16>, vector<32x64xbf16>, vector<8x64xf32> -> vector<8x64xf32>
    %c1_94 = arith.constant 1 : index
    %c0_95 = arith.constant 0 : index
    %c0_96 = arith.constant 0 : index
    %237 = vector.load %arg6[%c1_94, %c0_95, %c0_96] : memref<4x1x64xf32, #tpu.memory_space<vmem>>, vector<1x1x64xf32>
    %238 = vector.shape_cast %237 : vector<1x1x64xf32> to vector<1x64xf32>
    %239 = vector.broadcast %238 : vector<1x64xf32> to vector<8x64xf32>
    %240 = arith.addf %236, %239 : vector<8x64xf32>
    %cst_97 = arith.constant 0.000000e+00 : f32
    %241 = vector.broadcast %cst_97 : f32 to vector<8x64xf32>
    %242 = arith.maximumf %240, %241 : vector<8x64xf32>
    %243 = arith.truncf %242 : vector<8x64xf32> to vector<8x64xbf16>
    %c1_98 = arith.constant 1 : index
    %c0_99 = arith.constant 0 : index
    %c0_100 = arith.constant 0 : index
    %244 = vector.load %arg7[%c1_98, %c0_99, %c0_100] : memref<4x64x64xbf16, #tpu.memory_space<vmem>>, vector<1x64x64xbf16>
    %245 = vector.shape_cast %244 : vector<1x64x64xbf16> to vector<64x64xbf16>
    %cst_101 = arith.constant dense<0.000000e+00> : vector<8x64xf32>
    %246 = tpu.matmul %243, %245, %cst_101 {dimension_numbers = #tpu.dot_dimension_numbers<[1], [0], [0], [1], [0, 0, 1, 1], [], []>} : vector<8x64xbf16>, vector<64x64xbf16>, vector<8x64xf32> -> vector<8x64xf32>
    %c1_102 = arith.constant 1 : index
    %c0_103 = arith.constant 0 : index
    %c0_104 = arith.constant 0 : index
    %247 = vector.load %arg8[%c1_102, %c0_103, %c0_104] : memref<4x1x64xf32, #tpu.memory_space<vmem>>, vector<1x1x64xf32>
    %248 = vector.shape_cast %247 : vector<1x1x64xf32> to vector<1x64xf32>
    %249 = vector.broadcast %248 : vector<1x64xf32> to vector<8x64xf32>
    %250 = arith.addf %246, %249 : vector<8x64xf32>
    %cst_105 = arith.constant 0.000000e+00 : f32
    %251 = vector.broadcast %cst_105 : f32 to vector<8x64xf32>
    %252 = arith.maximumf %250, %251 : vector<8x64xf32>
    %253 = arith.truncf %252 : vector<8x64xf32> to vector<8x64xbf16>
    %c1_106 = arith.constant 1 : index
    %c0_107 = arith.constant 0 : index
    %c0_108 = arith.constant 0 : index
    %254 = vector.load %arg9[%c1_106, %c0_107, %c0_108] : memref<4x64x32xbf16, #tpu.memory_space<vmem>>, vector<1x64x32xbf16>
    %255 = vector.shape_cast %254 : vector<1x64x32xbf16> to vector<64x32xbf16>
    %cst_109 = arith.constant dense<0.000000e+00> : vector<8x32xf32>
    %256 = tpu.matmul %253, %255, %cst_109 {dimension_numbers = #tpu.dot_dimension_numbers<[1], [0], [0], [1], [0, 0, 1, 1], [], []>} : vector<8x64xbf16>, vector<64x32xbf16>, vector<8x32xf32> -> vector<8x32xf32>
    %c1_110 = arith.constant 1 : index
    %c0_111 = arith.constant 0 : index
    %c0_112 = arith.constant 0 : index
    %257 = vector.load %arg10[%c1_110, %c0_111, %c0_112] : memref<4x1x32xf32, #tpu.memory_space<vmem>>, vector<1x1x32xf32>
    %258 = vector.shape_cast %257 : vector<1x1x32xf32> to vector<1x32xf32>
    %259 = vector.broadcast %258 : vector<1x32xf32> to vector<8x32xf32>
    %260 = arith.addf %256, %259 : vector<8x32xf32>
    %c0_113 = arith.constant 0 : index
    %c0_114 = arith.constant 0 : index
    %c0_115 = arith.constant 0 : index
    %261 = vector.load %arg5[%c0_113, %c0_114, %c0_115] : memref<4x32x64xbf16, #tpu.memory_space<vmem>>, vector<1x32x64xbf16>
    %262 = vector.shape_cast %261 : vector<1x32x64xbf16> to vector<32x64xbf16>
    %cst_116 = arith.constant dense<0.000000e+00> : vector<64x64xf32>
    %263 = tpu.matmul %230, %262, %cst_116 {dimension_numbers = #tpu.dot_dimension_numbers<[1], [0], [0], [1], [0, 0, 1, 1], [], []>} : vector<64x32xbf16>, vector<32x64xbf16>, vector<64x64xf32> -> vector<64x64xf32>
    %c0_117 = arith.constant 0 : index
    %c0_118 = arith.constant 0 : index
    %c0_119 = arith.constant 0 : index
    %264 = vector.load %arg6[%c0_117, %c0_118, %c0_119] : memref<4x1x64xf32, #tpu.memory_space<vmem>>, vector<1x1x64xf32>
    %265 = vector.shape_cast %264 : vector<1x1x64xf32> to vector<1x64xf32>
    %266 = vector.broadcast %265 : vector<1x64xf32> to vector<64x64xf32>
    %267 = arith.addf %263, %266 : vector<64x64xf32>
    %cst_120 = arith.constant 0.000000e+00 : f32
    %268 = vector.broadcast %cst_120 : f32 to vector<64x64xf32>
    %269 = arith.maximumf %267, %268 : vector<64x64xf32>
    %270 = arith.truncf %269 : vector<64x64xf32> to vector<64x64xbf16>
    %c0_121 = arith.constant 0 : index
    %c0_122 = arith.constant 0 : index
    %c0_123 = arith.constant 0 : index
    %271 = vector.load %arg7[%c0_121, %c0_122, %c0_123] : memref<4x64x64xbf16, #tpu.memory_space<vmem>>, vector<1x64x64xbf16>
    %272 = vector.shape_cast %271 : vector<1x64x64xbf16> to vector<64x64xbf16>
    %cst_124 = arith.constant dense<0.000000e+00> : vector<64x64xf32>
    %273 = tpu.matmul %270, %272, %cst_124 {dimension_numbers = #tpu.dot_dimension_numbers<[1], [0], [0], [1], [0, 0, 1, 1], [], []>} : vector<64x64xbf16>, vector<64x64xbf16>, vector<64x64xf32> -> vector<64x64xf32>
    %c0_125 = arith.constant 0 : index
    %c0_126 = arith.constant 0 : index
    %c0_127 = arith.constant 0 : index
    %274 = vector.load %arg8[%c0_125, %c0_126, %c0_127] : memref<4x1x64xf32, #tpu.memory_space<vmem>>, vector<1x1x64xf32>
    %275 = vector.shape_cast %274 : vector<1x1x64xf32> to vector<1x64xf32>
    %276 = vector.broadcast %275 : vector<1x64xf32> to vector<64x64xf32>
    %277 = arith.addf %273, %276 : vector<64x64xf32>
    %cst_128 = arith.constant 0.000000e+00 : f32
    %278 = vector.broadcast %cst_128 : f32 to vector<64x64xf32>
    %279 = arith.maximumf %277, %278 : vector<64x64xf32>
    %280 = arith.truncf %279 : vector<64x64xf32> to vector<64x64xbf16>
    %c0_129 = arith.constant 0 : index
    %c0_130 = arith.constant 0 : index
    %c0_131 = arith.constant 0 : index
    %281 = vector.load %arg9[%c0_129, %c0_130, %c0_131] : memref<4x64x32xbf16, #tpu.memory_space<vmem>>, vector<1x64x32xbf16>
    %282 = vector.shape_cast %281 : vector<1x64x32xbf16> to vector<64x32xbf16>
    %cst_132 = arith.constant dense<0.000000e+00> : vector<64x32xf32>
    %283 = tpu.matmul %280, %282, %cst_132 {dimension_numbers = #tpu.dot_dimension_numbers<[1], [0], [0], [1], [0, 0, 1, 1], [], []>} : vector<64x64xbf16>, vector<64x32xbf16>, vector<64x32xf32> -> vector<64x32xf32>
    %c0_133 = arith.constant 0 : index
    %c0_134 = arith.constant 0 : index
    %c0_135 = arith.constant 0 : index
    %284 = vector.load %arg10[%c0_133, %c0_134, %c0_135] : memref<4x1x32xf32, #tpu.memory_space<vmem>>, vector<1x1x32xf32>
    %285 = vector.shape_cast %284 : vector<1x1x32xf32> to vector<1x32xf32>
    %286 = vector.broadcast %285 : vector<1x32xf32> to vector<64x32xf32>
    %287 = arith.addf %283, %286 : vector<64x32xf32>
    %288 = vector.shape_cast %287 : vector<64x32xf32> to vector<8x8x32xf32>
    %289 = vector.shape_cast %260 : vector<8x32xf32> to vector<1x8x32xf32>
    %290 = vector.broadcast %289 : vector<1x8x32xf32> to vector<8x8x32xf32>
    %291 = arith.mulf %288, %290 : vector<8x8x32xf32>
    %cst_136 = arith.constant dense<0xFF800000> : vector<8x32xf32>
    %292 = vector.multi_reduction <maximumf>, %291, %cst_136 [0] : vector<8x8x32xf32> to vector<8x32xf32>
    %293 = vector.shape_cast %291 : vector<8x8x32xf32> to vector<64x32xf32>
    %294 = arith.addf %231, %293 : vector<64x32xf32>
    %cst_137 = arith.constant 5.000000e-01 : f32
    %295 = vector.broadcast %cst_137 : f32 to vector<64x32xf32>
    %296 = arith.mulf %294, %295 : vector<64x32xf32>
    %297 = arith.addf %232, %292 : vector<8x32xf32>
    %cst_138 = arith.constant 5.000000e-01 : f32
    %298 = vector.broadcast %cst_138 : f32 to vector<8x32xf32>
    %299 = arith.mulf %297, %298 : vector<8x32xf32>
    %300 = arith.truncf %299 : vector<8x32xf32> to vector<8x32xbf16>
    %c3_139 = arith.constant 3 : index
    %c0_140 = arith.constant 0 : index
    %c0_141 = arith.constant 0 : index
    %301 = vector.load %arg5[%c3_139, %c0_140, %c0_141] : memref<4x32x64xbf16, #tpu.memory_space<vmem>>, vector<1x32x64xbf16>
    %302 = vector.shape_cast %301 : vector<1x32x64xbf16> to vector<32x64xbf16>
    %cst_142 = arith.constant dense<0.000000e+00> : vector<8x64xf32>
    %303 = tpu.matmul %300, %302, %cst_142 {dimension_numbers = #tpu.dot_dimension_numbers<[1], [0], [0], [1], [0, 0, 1, 1], [], []>} : vector<8x32xbf16>, vector<32x64xbf16>, vector<8x64xf32> -> vector<8x64xf32>
    %c3_143 = arith.constant 3 : index
    %c0_144 = arith.constant 0 : index
    %c0_145 = arith.constant 0 : index
    %304 = vector.load %arg6[%c3_143, %c0_144, %c0_145] : memref<4x1x64xf32, #tpu.memory_space<vmem>>, vector<1x1x64xf32>
    %305 = vector.shape_cast %304 : vector<1x1x64xf32> to vector<1x64xf32>
    %306 = vector.broadcast %305 : vector<1x64xf32> to vector<8x64xf32>
    %307 = arith.addf %303, %306 : vector<8x64xf32>
    %cst_146 = arith.constant 0.000000e+00 : f32
    %308 = vector.broadcast %cst_146 : f32 to vector<8x64xf32>
    %309 = arith.maximumf %307, %308 : vector<8x64xf32>
    %310 = arith.truncf %309 : vector<8x64xf32> to vector<8x64xbf16>
    %c3_147 = arith.constant 3 : index
    %c0_148 = arith.constant 0 : index
    %c0_149 = arith.constant 0 : index
    %311 = vector.load %arg7[%c3_147, %c0_148, %c0_149] : memref<4x64x64xbf16, #tpu.memory_space<vmem>>, vector<1x64x64xbf16>
    %312 = vector.shape_cast %311 : vector<1x64x64xbf16> to vector<64x64xbf16>
    %cst_150 = arith.constant dense<0.000000e+00> : vector<8x64xf32>
    %313 = tpu.matmul %310, %312, %cst_150 {dimension_numbers = #tpu.dot_dimension_numbers<[1], [0], [0], [1], [0, 0, 1, 1], [], []>} : vector<8x64xbf16>, vector<64x64xbf16>, vector<8x64xf32> -> vector<8x64xf32>
    %c3_151 = arith.constant 3 : index
    %c0_152 = arith.constant 0 : index
    %c0_153 = arith.constant 0 : index
    %314 = vector.load %arg8[%c3_151, %c0_152, %c0_153] : memref<4x1x64xf32, #tpu.memory_space<vmem>>, vector<1x1x64xf32>
    %315 = vector.shape_cast %314 : vector<1x1x64xf32> to vector<1x64xf32>
    %316 = vector.broadcast %315 : vector<1x64xf32> to vector<8x64xf32>
    %317 = arith.addf %313, %316 : vector<8x64xf32>
    %cst_154 = arith.constant 0.000000e+00 : f32
    %318 = vector.broadcast %cst_154 : f32 to vector<8x64xf32>
    %319 = arith.maximumf %317, %318 : vector<8x64xf32>
    %320 = arith.truncf %319 : vector<8x64xf32> to vector<8x64xbf16>
    %c3_155 = arith.constant 3 : index
    %c0_156 = arith.constant 0 : index
    %c0_157 = arith.constant 0 : index
    %321 = vector.load %arg9[%c3_155, %c0_156, %c0_157] : memref<4x64x32xbf16, #tpu.memory_space<vmem>>, vector<1x64x32xbf16>
    %322 = vector.shape_cast %321 : vector<1x64x32xbf16> to vector<64x32xbf16>
    %cst_158 = arith.constant dense<0.000000e+00> : vector<8x32xf32>
    %323 = tpu.matmul %320, %322, %cst_158 {dimension_numbers = #tpu.dot_dimension_numbers<[1], [0], [0], [1], [0, 0, 1, 1], [], []>} : vector<8x64xbf16>, vector<64x32xbf16>, vector<8x32xf32> -> vector<8x32xf32>
    %c3_159 = arith.constant 3 : index
    %c0_160 = arith.constant 0 : index
    %c0_161 = arith.constant 0 : index
    %324 = vector.load %arg10[%c3_159, %c0_160, %c0_161] : memref<4x1x32xf32, #tpu.memory_space<vmem>>, vector<1x1x32xf32>
    %325 = vector.shape_cast %324 : vector<1x1x32xf32> to vector<1x32xf32>
    %326 = vector.broadcast %325 : vector<1x32xf32> to vector<8x32xf32>
    %327 = arith.addf %323, %326 : vector<8x32xf32>
    %328 = arith.truncf %296 : vector<64x32xf32> to vector<64x32xbf16>
    %c2_162 = arith.constant 2 : index
    %c0_163 = arith.constant 0 : index
    %c0_164 = arith.constant 0 : index
    %329 = vector.load %arg5[%c2_162, %c0_163, %c0_164] : memref<4x32x64xbf16, #tpu.memory_space<vmem>>, vector<1x32x64xbf16>
    %330 = vector.shape_cast %329 : vector<1x32x64xbf16> to vector<32x64xbf16>
    %cst_165 = arith.constant dense<0.000000e+00> : vector<64x64xf32>
    %331 = tpu.matmul %328, %330, %cst_165 {dimension_numbers = #tpu.dot_dimension_numbers<[1], [0], [0], [1], [0, 0, 1, 1], [], []>} : vector<64x32xbf16>, vector<32x64xbf16>, vector<64x64xf32> -> vector<64x64xf32>
    %c2_166 = arith.constant 2 : index
    %c0_167 = arith.constant 0 : index
    %c0_168 = arith.constant 0 : index
    %332 = vector.load %arg6[%c2_166, %c0_167, %c0_168] : memref<4x1x64xf32, #tpu.memory_space<vmem>>, vector<1x1x64xf32>
    %333 = vector.shape_cast %332 : vector<1x1x64xf32> to vector<1x64xf32>
    %334 = vector.broadcast %333 : vector<1x64xf32> to vector<64x64xf32>
    %335 = arith.addf %331, %334 : vector<64x64xf32>
    %cst_169 = arith.constant 0.000000e+00 : f32
    %336 = vector.broadcast %cst_169 : f32 to vector<64x64xf32>
    %337 = arith.maximumf %335, %336 : vector<64x64xf32>
    %338 = arith.truncf %337 : vector<64x64xf32> to vector<64x64xbf16>
    %c2_170 = arith.constant 2 : index
    %c0_171 = arith.constant 0 : index
    %c0_172 = arith.constant 0 : index
    %339 = vector.load %arg7[%c2_170, %c0_171, %c0_172] : memref<4x64x64xbf16, #tpu.memory_space<vmem>>, vector<1x64x64xbf16>
    %340 = vector.shape_cast %339 : vector<1x64x64xbf16> to vector<64x64xbf16>
    %cst_173 = arith.constant dense<0.000000e+00> : vector<64x64xf32>
    %341 = tpu.matmul %338, %340, %cst_173 {dimension_numbers = #tpu.dot_dimension_numbers<[1], [0], [0], [1], [0, 0, 1, 1], [], []>} : vector<64x64xbf16>, vector<64x64xbf16>, vector<64x64xf32> -> vector<64x64xf32>
    %c2_174 = arith.constant 2 : index
    %c0_175 = arith.constant 0 : index
    %c0_176 = arith.constant 0 : index
    %342 = vector.load %arg8[%c2_174, %c0_175, %c0_176] : memref<4x1x64xf32, #tpu.memory_space<vmem>>, vector<1x1x64xf32>
    %343 = vector.shape_cast %342 : vector<1x1x64xf32> to vector<1x64xf32>
    %344 = vector.broadcast %343 : vector<1x64xf32> to vector<64x64xf32>
    %345 = arith.addf %341, %344 : vector<64x64xf32>
    %cst_177 = arith.constant 0.000000e+00 : f32
    %346 = vector.broadcast %cst_177 : f32 to vector<64x64xf32>
    %347 = arith.maximumf %345, %346 : vector<64x64xf32>
    %348 = arith.truncf %347 : vector<64x64xf32> to vector<64x64xbf16>
    %c2_178 = arith.constant 2 : index
    %c0_179 = arith.constant 0 : index
    %c0_180 = arith.constant 0 : index
    %349 = vector.load %arg9[%c2_178, %c0_179, %c0_180] : memref<4x64x32xbf16, #tpu.memory_space<vmem>>, vector<1x64x32xbf16>
    %350 = vector.shape_cast %349 : vector<1x64x32xbf16> to vector<64x32xbf16>
    %cst_181 = arith.constant dense<0.000000e+00> : vector<64x32xf32>
    %351 = tpu.matmul %348, %350, %cst_181 {dimension_numbers = #tpu.dot_dimension_numbers<[1], [0], [0], [1], [0, 0, 1, 1], [], []>} : vector<64x64xbf16>, vector<64x32xbf16>, vector<64x32xf32> -> vector<64x32xf32>
    %c2_182 = arith.constant 2 : index
    %c0_183 = arith.constant 0 : index
    %c0_184 = arith.constant 0 : index
    %352 = vector.load %arg10[%c2_182, %c0_183, %c0_184] : memref<4x1x32xf32, #tpu.memory_space<vmem>>, vector<1x1x32xf32>
    %353 = vector.shape_cast %352 : vector<1x1x32xf32> to vector<1x32xf32>
    %354 = vector.broadcast %353 : vector<1x32xf32> to vector<64x32xf32>
    %355 = arith.addf %351, %354 : vector<64x32xf32>
    %356 = vector.shape_cast %355 : vector<64x32xf32> to vector<8x8x32xf32>
    %357 = vector.shape_cast %327 : vector<8x32xf32> to vector<1x8x32xf32>
    %358 = vector.broadcast %357 : vector<1x8x32xf32> to vector<8x8x32xf32>
    %359 = arith.mulf %356, %358 : vector<8x8x32xf32>
    %cst_185 = arith.constant dense<0xFF800000> : vector<8x32xf32>
    %360 = vector.multi_reduction <maximumf>, %359, %cst_185 [0] : vector<8x8x32xf32> to vector<8x32xf32>
    %cst_186 = arith.constant 2.000000e+00 : f32
    %361 = vector.broadcast %cst_186 : f32 to vector<8x32xf32>
    %362 = arith.mulf %299, %361 : vector<8x32xf32>
    %363 = arith.addf %362, %360 : vector<8x32xf32>
    %cst_187 = arith.constant 3.000000e+00 : f32
    %364 = vector.broadcast %cst_187 : f32 to vector<8x32xf32>
    %365 = arith.divf %363, %364 : vector<8x32xf32>
    %c0_188 = arith.constant 0 : index
    %c0_189 = arith.constant 0 : index
    %366 = vector.load %arg11[%c0_188, %c0_189] : memref<8x32xf32, #tpu.memory_space<vmem>>, vector<8x32xf32>
    tpu.vector_store %arg11[%c0_188, %c0_189], %365 {strides = array<i32>} : memref<8x32xf32, #tpu.memory_space<vmem>>, vector<8x32xf32>,
    return
  }
  func.func @transform_0(%arg0: i32) -> (i32, i32, i32) {
    %c0_i32 = arith.constant 0 : i32
    %c0_i32_0 = arith.constant 0 : i32
    %c0_i32_1 = arith.constant 0 : i32
    return %c0_i32, %arg0, %c0_i32_0 : i32, i32, i32
  }
  func.func @transform_1(%arg0: i32) -> (i32, i32) {
    %c0_i32 = arith.constant 0 : i32
    %c0_i32_0 = arith.constant 0 : i32
    %c0_i32_1 = arith.constant 0 : i32
    return %c0_i32, %c0_i32_0 : i32, i32
  }
  func.func @transform_2(%arg0: i32) -> (i32, i32) {
    %c0_i32 = arith.constant 0 : i32
    %c0_i32_0 = arith.constant 0 : i32
    %c0_i32_1 = arith.constant 0 : i32
    return %c0_i32, %c0_i32_0 : i32, i32
  }
  func.func @transform_3(%arg0: i32) -> (i32, i32) {
    %c0_i32 = arith.constant 0 : i32
    %c0_i32_0 = arith.constant 0 : i32
    %c0_i32_1 = arith.constant 0 : i32
    return %c0_i32, %c0_i32_0 : i32, i32
  }
  func.func @transform_4(%arg0: i32) -> (i32, i32, i32) {
    %c0_i32 = arith.constant 0 : i32
    %c0_i32_0 = arith.constant 0 : i32
    %c0_i32_1 = arith.constant 0 : i32
    %c0_i32_2 = arith.constant 0 : i32
    return %c0_i32, %c0_i32_0, %c0_i32_1 : i32, i32, i32
  }
  func.func @transform_5(%arg0: i32) -> (i32, i32, i32) {
    %c0_i32 = arith.constant 0 : i32
    %c0_i32_0 = arith.constant 0 : i32
    %c0_i32_1 = arith.constant 0 : i32
    %c0_i32_2 = arith.constant 0 : i32
    return %c0_i32, %c0_i32_0, %c0_i32_1 : i32, i32, i32
  }
  func.func @transform_6(%arg0: i32) -> (i32, i32, i32) {
    %c0_i32 = arith.constant 0 : i32
    %c0_i32_0 = arith.constant 0 : i32
    %c0_i32_1 = arith.constant 0 : i32
    %c0_i32_2 = arith.constant 0 : i32
    return %c0_i32, %c0_i32_0, %c0_i32_1 : i32, i32, i32
  }
  func.func @transform_7(%arg0: i32) -> (i32, i32, i32) {
    %c0_i32 = arith.constant 0 : i32
    %c0_i32_0 = arith.constant 0 : i32
    %c0_i32_1 = arith.constant 0 : i32
    %c0_i32_2 = arith.constant 0 : i32
    return %c0_i32, %c0_i32_0, %c0_i32_1 : i32, i32, i32
  }
  func.func @transform_8(%arg0: i32) -> (i32, i32, i32) {
    %c0_i32 = arith.constant 0 : i32
    %c0_i32_0 = arith.constant 0 : i32
    %c0_i32_1 = arith.constant 0 : i32
    %c0_i32_2 = arith.constant 0 : i32
    return %c0_i32, %c0_i32_0, %c0_i32_1 : i32, i32, i32
  }
  func.func @transform_9(%arg0: i32) -> (i32, i32, i32) {
    %c0_i32 = arith.constant 0 : i32
    %c0_i32_0 = arith.constant 0 : i32
    %c0_i32_1 = arith.constant 0 : i32
    %c0_i32_2 = arith.constant 0 : i32
    return %c0_i32, %c0_i32_0, %c0_i32_1 : i32, i32, i32
  }
  func.func @transform_10(%arg0: i32) -> (i32, i32) {
    %c0_i32 = arith.constant 0 : i32
    %c0_i32_0 = arith.constant 0 : i32
    return %arg0, %c0_i32 : i32, i32
  }
}

</mosaic_0001>

<bundles_post_ra>
// kernel: encoder_forward.1
= control target key start
LH: loop header
LB: loop body
LE: loop exit
PB: predicated region body
PF: predicated region fallthrough
CT: control target
= control target key end

     0   :  { %vm70_vm0 = vcmask 1041408   ;;  %v2761_v1 = vmov 0.0   ;;  %vm2762_vm1 = vmmov 0   ;;  %vm57_vm2 = vcmask 31744   ;;  %s2765_s27 = smov 32   ;;  %s3310_s1 = inlined_call_operand.vmem [shape: bf16[4,128], index: 1, kind: input, shape index: {}]   ;;  %s3311_s2 = inlined_call_operand.vmem [shape: bf16[32,128], index: 2, kind: input, shape index: {}]   ;;  %s3312_s0 = inlined_call_operand.vmem [shape: f32[8,8,4], index: 0, kind: input, shape index: {}]   ;;  %s3313_s3 = inlined_call_operand.vmem [shape: f32[1,128], index: 3, kind: input, shape index: {}]   ;;  %s3314_s4 = inlined_call_operand.vmem [shape: bf16[4,32,64], index: 4, kind: input, shape index: {}]   ;;  %s3315_s6 = inlined_call_operand.vmem [shape: bf16[4,64,64], index: 6, kind: input, shape index: {}]   ;;  %s3316_s5 = inlined_call_operand.vmem [shape: f32[4,1,64], index: 5, kind: input, shape index: {}]   ;;  %s3317_s8 = inlined_call_operand.vmem [shape: bf16[4,64,32], index: 8, kind: input, shape index: {}]   ;;  %s3318_s7 = inlined_call_operand.vmem [shape: f32[4,1,64], index: 7, kind: input, shape index: {}]   ;;  %s3319_s9 = inlined_call_operand.vmem [shape: f32[4,1,32], index: 9, kind: input, shape index: {}]   ;;  %s3320_s10 = inlined_call_operand.vmem [shape: f32[8,32], index: 10, kind: output, shape index: {}]  }
   0x1   :  { %v49_v0 = vld [vmem:[%s3310_s1] sm:$0x3]  ;;  %2440 = vmatprep.subr.bf16.mxu1 %v2761_v1  ;;  %2444 = vmatprep.mubr.msk.bf16.mxu1 %vm2762_vm1, %v2761_v1  ;;  %v38_v5 = vld [vmem:[%s3312_s0 + $0x8] sm:$0xff]  ;;  %v39_v7 = vld [vmem:[%s3312_s0 + $0x10] sm:$0xff]  ;;  %v2763_v11 = vmov 0   ;;  %vm164_vm3 = vcmask 261120  }
   0x2   :  { %2656 = vmatprep.subr.msk.bf16.mxu0 %vm70_vm0, %v49_v0  ;;  %v72_v2 = vsel %vm70_vm0, %v49_v0, 0  ;;  %v2831_v3 = vld [vmem:[%s3311_s2] sm:$0xff]   ;;  %v40_v8 = vld [vmem:[%s3312_s0 + $0x18] sm:$0xff]  ;;  %v2849_v10 = vld [vmem:[%s3311_s2 + $0x8] sm:$0xff]   ;;  %vm241_vm4 = vcmask 257024   ;;  %vm944_vm5 = vcmask 523264  }
   0x3   :  { %v37_v4 = vld [vmem:[%s3312_s0] sm:$0xff]  ;;  %2431 = vmatpush3.bf16.msra.mxu0 %v72_v2  ;;  %2441 = vmatpush3.bf16.msra.mxu1 %v2831_v3  ;;  %v46_v9 = vpack.c.bf16 %v40_v8, %v39_v7  ;;  %v42_v57 = vld [vmem:[%s3312_s0 + $0x28] sm:$0xff]  ;;  %v43_v58 = vld [vmem:[%s3312_s0 + $0x30] sm:$0xff] }
   0x4   :  { %v45_v6 = vpack.c.bf16 %v38_v5, %v37_v4  ;;  %2456 = vmatprep.subr.bf16.mxu0 %v2761_v1  ;;  %2442 = vmatprep.subr.bf16.mxu1 %v2761_v1  ;;  %v2870_v12 = vld [vmem:[%s3313_s3] ss:$0 sm:$0xff]  ;;  %s2764_s3 = smov 64   ;;  %v44_v60 = vld [vmem:[%s3312_s0 + $0x38] sm:$0xff] }
   0x5   :  { %v41_v56 = vld [vmem:[%s3312_s0 + $0x20] sm:$0xff]  ;;  %v48_v61 = vpack.c.bf16 %v44_v60, %v43_v58 }
   0x6   :  { %2432 = vmatprep.mubr.msk.bf16.mxu0 %vm57_vm2, %v45_v6  ;;  %v47_v59 = vpack.c.bf16 %v42_v57, %v41_v56 }
   0x7   :  { %2433 = vmatmul.mubr.msk.bf16.vlgmr.msra.gmra.mrb[0].mxu0 %vm57_vm2, %v46_v9  ;;  %2443 = vmatpush3.bf16.msra.mxu1 %v2849_v10 }
   0x8   :  { %2457 = vmatpush3.bf16.msra.mxu0 %v2831_v3  ;;  %2448 = vmatprep.subr.bf16.mxu1 %v2761_v1 }
   0x9   :  { %2458 = vmatprep.subr.bf16.mxu0 %v2761_v1  ;;  %2436 = vmatprep.mubr.msk.bf16.mxu0 %vm57_vm2, %v47_v59 }
   0xa   :  { %2445 = vmatmul.mubr.bf16.vlgmr.msra.gmra.mrb[0].mxu1 %v2763_v11 }
   0xb   :  { %2449 = vmatpush3.bf16.msra.mxu1 %v2831_v3  ;;  %2452 = vmatprep.mubr.msk.bf16.mxu1 %vm2762_vm1, %v2761_v1 }
   0xc   :  { %2459 = vmatpush3.bf16.msra.mxu0 %v2849_v10  ;;  %2450 = vmatprep.subr.bf16.mxu1 %v2761_v1 }
   0xd   :  { %2472 = vmatprep.subr.bf16.mxu0 %v2761_v1 }
   0xf   :  { %2451 = vmatpush3.bf16.msra.mxu1 %v2849_v10  ;;  %2437 = vmatmul.mubr.msk.bf16.gmra.mrb[4].mxu0 %vm57_vm2, %v48_v61 }
  0x10   :  { %2464 = vmatprep.subr.bf16.mxu1 %v2761_v1  ;;  %2460 = vmatprep.mubr.msk.bf16.mxu0 %vm2762_vm1, %v2761_v1 }
  0xda   :  { %v2872_v13 = vpop.f32.mrb[0].mxu0 }
  0xdb   :  { %v108_v14 = vpop.f32.mrb[1].mxu0  ;;  %v117_v9 = vadd.f32 %v2872_v13, %v2870_v12 }
  0xdc   :  { %v109_v15 = vadd.f32 %v2870_v12, %v108_v14  ;;  %v2875_v16 = vpop.f32.mrb[2].mxu0 }
  0xdd   :  { %v111_v17 = vpop.f32.mrb[3].mxu0  ;;  %v202_v18 = vpop.f32.mrb[0].mxu1 }
  0xde   :  { %v208_v19 = vadd.f32 %v202_v18, %v109_v15  ;;  %v2446_v20 = vpop.f32.mrb[1].mxu1  ;;  %v112_v39 = vadd.f32 %v2870_v12, %v111_v17 }
  0xdf   :  { %v205_v21 = vpop.f32.mrb[2].mxu1 }
  0xe0   :  { %v2137_v22 = vmul.f32 -1.442695, %v208_v19  ;;  %v2447_v23 = vpop.f32.mrb[3].mxu1 }
  0xe2   :  { %2713 = vpow2.f32 %v2137_v22  ;;  %v2915_v4 = vpop.f32.mrb[4].mxu0 }
  0xe3   :  { %v2917_v5 = vpop.f32.mrb[5].mxu0 }
  0xe4   :  { %v2919_v6 = vpop.f32.mrb[6].mxu0  ;;  %v125_v56 = vadd.f32 %v2870_v12, %v2917_v5 }
  0xe5   :  { %v2921_v7 = vpop.f32.mrb[7].mxu0 }
  0xec   :  { %v2714_v24 = vpop.eup %2713 }
  0xed   :  { %v212_v25 = vadd.f32 1.0, %v2714_v24 }
  0xef   :  { %2715 = vrcp.f32 %v212_v25 }
  0xf9   :  { %v2716_v26 = vpop.eup %2715 }
  0xfa   :  { %v215_v27 = vmul.f32 2.0, %v2716_v26  ;;  %v217_v31 = vmul.f32 0.0, %v2716_v26 }
  0xfc   :  { %v2138_v28 = vadd.f32 -1.0, %v215_v27 }
  0xfe   :  { %219 = vrot.lane.b32.xlu0 %v2138_v28, %s2764_s3 }
 0x170   :  { %v220_v29 = vpop.permute.xlu0 %219 }
 0x171   :  { %v222_v30 = vmul.f32 %v2716_v26, %v220_v29 }
 0x173   :  { %224 = vrot.lane.b32.xlu0 %v222_v30, %s2765_s27 }
 0x1e5   :  { %v225_v32 = vpop.permute.xlu0 %224 }
 0x1e6   :  { %v227_v33 = vadd.f32 %v225_v32, %v217_v31 }
 0x1e8   :  { %2717 = vtanh.f32 %v227_v33 }
 0x1f2   :  { %v2718_v34 = vpop.eup %2717 }
 0x1f3   :  { %230 = vrot.lane.b32.xlu1 %v2718_v34, %s2764_s3  ;;  %v120_v34 = vadd.f32 %v2875_v16, %v2870_v12 }
 0x265   :  { %v231_v35 = vpop.permute.xlu1 %230 }
 0x266   :  { %v233_v36 = vmul.f32 %v2716_v26, %v231_v35 }
 0x268   :  { %v2880_v37 = vpack.c.bf16 %v233_v36, %v233_v36 }
 0x26a   :  { %245 = vrot.lane.b32.xlu1 %v2880_v37, %s2765_s27 }
 0x2dc   :  { %v246_v38 = vpop.permute.xlu1 %245 }
 0x2dd   :  { %2453 = vmatmul.mubr.msk.bf16.vlgmr.msra.gmra.mrb[4].mxu1 %vm164_vm3, %v246_v38 }
 0x2de   :  { %2465 = vmatpush3.bf16.msra.mxu1 %v2831_v3  ;;  %2468 = vmatprep.mubr.msk.bf16.mxu1 %vm2762_vm1, %v2761_v1 }
 0x2df   :  { %2466 = vmatprep.subr.bf16.mxu1 %v2761_v1 }
 0x2e2   :  { %2467 = vmatpush3.bf16.msra.mxu1 %v2849_v10 }
 0x2e3   :  { %2480 = vmatprep.subr.bf16.mxu1 %v2761_v1 }
 0x3b0   :  { %v284_v40 = vpop.f32.mrb[4].mxu1 }
 0x3b1   :  { %v290_v41 = vadd.f32 %v284_v40, %v112_v39  ;;  %v2454_v42 = vpop.f32.mrb[5].mxu1 }
 0x3b2   :  { %v287_v43 = vpop.f32.mrb[6].mxu1 }
 0x3b3   :  { %v2141_v44 = vmul.f32 -1.442695, %v290_v41  ;;  %v2455_v45 = vpop.f32.mrb[7].mxu1 }
 0x3b5   :  { %2719 = vpow2.f32 %v2141_v44 }
 0x3bf   :  { %v2720_v46 = vpop.eup %2719 }
 0x3c0   :  { %v294_v47 = vadd.f32 1.0, %v2720_v46 }
 0x3c2   :  { %2721 = vrcp.f32 %v294_v47 }
 0x3cc   :  { %v2722_v48 = vpop.eup %2721 }
 0x3cd   :  { %v297_v49 = vmul.f32 2.0, %v2722_v48  ;;  %v299_v53 = vmul.f32 %v2722_v48, %v227_v33 }
 0x3cf   :  { %v2142_v50 = vadd.f32 -1.0, %v297_v49 }
 0x3d1   :  { %301 = vrot.lane.b32.xlu0 %v2142_v50, %s2764_s3 }
 0x443   :  { %v302_v51 = vpop.permute.xlu0 %301 }
 0x444   :  { %v304_v52 = vmul.f32 %v2722_v48, %v302_v51 }
 0x446   :  { %306 = vrot.lane.b32.xlu1 %v304_v52, %s2765_s27 }
 0x4b8   :  { %v307_v54 = vpop.permute.xlu1 %306 }
 0x4b9   :  { %v309_v55 = vadd.f32 %v307_v54, %v299_v53 }
 0x4bb   :  { %2723 = vtanh.f32 %v309_v55 }
 0x4c5   :  { %v2724_v62 = vpop.eup %2723 }
 0x4c6   :  { %312 = vrot.lane.b32.xlu0 %v2724_v62, %s2764_s3 }
 0x538   :  { %v313_v63 = vpop.permute.xlu0 %312 }
 0x539   :  { %v315_v0 = vmul.f32 %v2722_v48, %v313_v63 }
 0x53b   :  { %v2911_v2 = vpack.c.bf16 %v315_v0, %v315_v0 }
 0x53d   :  { %327 = vrot.lane.b32.xlu1 %v2911_v2, %s2765_s27 }
 0x5af   :  { %v328_v8 = vpop.permute.xlu1 %327 }
 0x5b0   :  { %2461 = vmatmul.mubr.msk.bf16.vlgmr.msra.gmra.mrb[8].mxu0 %vm164_vm3, %v328_v8 }
 0x5b1   :  { %2473 = vmatpush3.bf16.msra.mxu0 %v2831_v3  ;;  %2476 = vmatprep.mubr.msk.bf16.mxu0 %vm2762_vm1, %v2761_v1 }
 0x5b2   :  { %2474 = vmatprep.subr.bf16.mxu0 %v2761_v1 }
 0x5b5   :  { %2475 = vmatpush3.bf16.msra.mxu0 %v2849_v10 }
 0x5b6   :  { %2488 = vmatprep.subr.bf16.mxu0 %v2761_v1 }
 0x683   :  { %v366_v11 = vpop.f32.mrb[8].mxu0 }
 0x684   :  { %v372_v14 = vadd.f32 %v366_v11, %v117_v9  ;;  %v2462_v15 = vpop.f32.mrb[9].mxu0 }
 0x685   :  { %v369_v17 = vpop.f32.mrb[10].mxu0 }
 0x686   :  { %v2145_v18 = vmul.f32 -1.442695, %v372_v14  ;;  %v2463_v19 = vpop.f32.mrb[11].mxu0 }
 0x688   :  { %2725 = vpow2.f32 %v2145_v18 }
 0x692   :  { %v2726_v20 = vpop.eup %2725 }
 0x693   :  { %v376_v21 = vadd.f32 1.0, %v2726_v20 }
 0x695   :  { %2727 = vrcp.f32 %v376_v21 }
 0x69f   :  { %v2728_v22 = vpop.eup %2727 }
 0x6a0   :  { %v379_v23 = vmul.f32 2.0, %v2728_v22  ;;  %v381_v13 = vmul.f32 %v2728_v22, %v309_v55 }
 0x6a2   :  { %v2146_v24 = vadd.f32 -1.0, %v379_v23 }
 0x6a4   :  { %383 = vrot.lane.b32.xlu0 %v2146_v24, %s2764_s3  ;;  %v128_v24 = vadd.f32 %v2870_v12, %v2921_v7 }
 0x716   :  { %v384_v25 = vpop.permute.xlu0 %383 }
 0x717   :  { %v386_v26 = vmul.f32 %v2728_v22, %v384_v25 }
 0x719   :  { %388 = vrot.lane.b32.xlu1 %v386_v26, %s2765_s27 }
 0x78b   :  { %v389_v27 = vpop.permute.xlu1 %388 }
 0x78c   :  { %v391_v28 = vadd.f32 %v389_v27, %v381_v13 }
 0x78e   :  { %2729 = vtanh.f32 %v391_v28 }
 0x798   :  { %v2730_v29 = vpop.eup %2729 }
 0x799   :  { %394 = vrot.lane.b32.xlu0 %v2730_v29, %s2764_s3 }
 0x80b   :  { %v395_v30 = vpop.permute.xlu0 %394 }
 0x80c   :  { %v397_v31 = vmul.f32 %v2728_v22, %v395_v30 }
 0x80e   :  { %v2935_v32 = vpack.c.bf16 %v397_v31, %v397_v31 }
 0x810   :  { %409 = vrot.lane.b32.xlu1 %v2935_v32, %s2765_s27 }
 0x882   :  { %v410_v33 = vpop.permute.xlu1 %409 }
 0x883   :  { %2469 = vmatmul.mubr.msk.bf16.vlgmr.msra.gmra.mrb[8].mxu1 %vm164_vm3, %v410_v33 }
 0x884   :  { %2481 = vmatpush3.bf16.msra.mxu1 %v2831_v3  ;;  %2484 = vmatprep.mubr.msk.bf16.mxu1 %vm2762_vm1, %v2761_v1 }
 0x885   :  { %2482 = vmatprep.subr.bf16.mxu1 %v2761_v1 }
 0x888   :  { %2483 = vmatpush3.bf16.msra.mxu1 %v2849_v10 }
 0x889   :  { %2496 = vmatprep.subr.bf16.mxu1 %v2761_v1 }
 0x956   :  { %v448_v35 = vpop.f32.mrb[8].mxu1 }
 0x957   :  { %v454_v36 = vadd.f32 %v448_v35, %v120_v34  ;;  %v2470_v38 = vpop.f32.mrb[9].mxu1 }
 0x958   :  { %v451_v39 = vpop.f32.mrb[10].mxu1 }
 0x959   :  { %v2149_v40 = vmul.f32 -1.442695, %v454_v36  ;;  %v2471_v41 = vpop.f32.mrb[11].mxu1 }
 0x95b   :  { %2731 = vpow2.f32 %v2149_v40 }
 0x965   :  { %v2732_v42 = vpop.eup %2731 }
 0x966   :  { %v458_v43 = vadd.f32 1.0, %v2732_v42 }
 0x968   :  { %2733 = vrcp.f32 %v458_v43 }
 0x972   :  { %v2734_v44 = vpop.eup %2733 }
 0x973   :  { %v461_v45 = vmul.f32 2.0, %v2734_v44  ;;  %v463_v16 = vmul.f32 %v2734_v44, %v391_v28 }
 0x975   :  { %v2150_v46 = vadd.f32 -1.0, %v461_v45 }
 0x977   :  { %465 = vrot.lane.b32.xlu0 %v2150_v46, %s2764_s3 }
 0x9e9   :  { %v466_v47 = vpop.permute.xlu0 %465 }
 0x9ea   :  { %v468_v48 = vmul.f32 %v2734_v44, %v466_v47 }
 0x9ec   :  { %470 = vrot.lane.b32.xlu1 %v468_v48, %s2765_s27 }
 0xa5e   :  { %v471_v49 = vpop.permute.xlu1 %470 }
 0xa5f   :  { %v473_v50 = vadd.f32 %v471_v49, %v463_v16 }
 0xa61   :  { %2735 = vtanh.f32 %v473_v50 }
 0xa6b   :  { %v2736_v51 = vpop.eup %2735 }
 0xa6c   :  { %476 = vrot.lane.b32.xlu0 %v2736_v51, %s2764_s3 }
 0xade   :  { %v477_v52 = vpop.permute.xlu0 %476 }
 0xadf   :  { %v479_v53 = vmul.f32 %v2734_v44, %v477_v52  ;;  %v133_v44 = vadd.f32 %v2915_v4, %v2870_v12 }
 0xae1   :  { %v2951_v54 = vpack.c.bf16 %v479_v53, %v479_v53 }
 0xae3   :  { %491 = vrot.lane.b32.xlu1 %v2951_v54, %s2765_s27 }
 0xb55   :  { %v492_v55 = vpop.permute.xlu1 %491 }
 0xb56   :  { %2477 = vmatmul.mubr.msk.bf16.vlgmr.msra.gmra.mrb[12].mxu0 %vm164_vm3, %v492_v55 }
 0xb57   :  { %2489 = vmatpush3.bf16.msra.mxu0 %v2831_v3  ;;  %2492 = vmatprep.mubr.msk.bf16.mxu0 %vm2762_vm1, %v2761_v1 }
 0xb58   :  { %2490 = vmatprep.subr.bf16.mxu0 %v2761_v1 }
 0xb5b   :  { %2491 = vmatpush3.bf16.msra.mxu0 %v2849_v10 }
 0xb5c   :  { %2504 = vmatprep.subr.bf16.mxu0 %v2761_v1 }
 0xc29   :  { %v530_v57 = vpop.f32.mrb[12].mxu0 }
 0xc2a   :  { %v536_v58 = vadd.f32 %v530_v57, %v125_v56  ;;  %v2478_v59 = vpop.f32.mrb[13].mxu0 }
 0xc2b   :  { %v533_v60 = vpop.f32.mrb[14].mxu0 }
 0xc2c   :  { %v2153_v61 = vmul.f32 -1.442695, %v536_v58  ;;  %v2479_v62 = vpop.f32.mrb[15].mxu0 }
 0xc2e   :  { %2737 = vpow2.f32 %v2153_v61 }
 0xc38   :  { %v2738_v63 = vpop.eup %2737 }
 0xc39   :  { %v540_v0 = vadd.f32 1.0, %v2738_v63 }
 0xc3b   :  { %2739 = vrcp.f32 %v540_v0 }
 0xc45   :  { %v2740_v8 = vpop.eup %2739 }
 0xc46   :  { %v543_v9 = vmul.f32 2.0, %v2740_v8  ;;  %v545_v5 = vmul.f32 %v2740_v8, %v473_v50 }
 0xc48   :  { %v2154_v11 = vadd.f32 -1.0, %v543_v9 }
 0xc4a   :  { %547 = vrot.lane.b32.xlu0 %v2154_v11, %s2764_s3 }
 0xcbc   :  { %v548_v14 = vpop.permute.xlu0 %547 }
 0xcbd   :  { %v550_v15 = vmul.f32 %v2740_v8, %v548_v14 }
 0xcbf   :  { %552 = vrot.lane.b32.xlu1 %v550_v15, %s2765_s27 }
 0xd31   :  { %v553_v17 = vpop.permute.xlu1 %552 }
 0xd32   :  { %v555_v18 = vadd.f32 %v553_v17, %v545_v5 }
 0xd34   :  { %2741 = vtanh.f32 %v555_v18 }
 0xd3e   :  { %v2742_v19 = vpop.eup %2741 }
 0xd3f   :  { %558 = vrot.lane.b32.xlu0 %v2742_v19, %s2764_s3 }
 0xdb1   :  { %v559_v20 = vpop.permute.xlu0 %558 }
 0xdb2   :  { %v561_v21 = vmul.f32 %v2740_v8, %v559_v20  ;;  %v136_v8 = vadd.f32 %v2919_v6, %v2870_v12  ;;  %v2665_v12 = vld [vmem:[%s3314_s4 + $0x10] sm:$0xff]   ;;  %v2666_v6 = vld [vmem:[%s3314_s4 + $0x18] sm:$0xff]  }
 0xdb4   :  { %v2967_v22 = vpack.c.bf16 %v561_v21, %v561_v21 }
 0xdb6   :  { %573 = vrot.lane.b32.xlu1 %v2967_v22, %s2765_s27 }
 0xe28   :  { %v574_v23 = vpop.permute.xlu1 %573 }
 0xe29   :  { %2485 = vmatmul.mubr.msk.bf16.vlgmr.msra.gmra.mrb[12].mxu1 %vm164_vm3, %v574_v23 }
 0xe2a   :  { %2497 = vmatpush3.bf16.msra.mxu1 %v2831_v3  ;;  %2500 = vmatprep.mubr.msk.bf16.mxu1 %vm2762_vm1, %v2761_v1 }
 0xe2b   :  { %2498 = vmatprep.subr.bf16.mxu1 %v2761_v1 }
 0xe2e   :  { %2499 = vmatpush3.bf16.msra.mxu1 %v2849_v10 }
 0xe2f   :  { %2512 = vmatprep.subr.bf16.mxu1 %v2761_v1 }
 0xefc   :  { %v612_v25 = vpop.f32.mrb[12].mxu1 }
 0xefd   :  { %v618_v26 = vadd.f32 %v612_v25, %v128_v24  ;;  %v2486_v13 = vpop.f32.mrb[13].mxu1  ;;  %v2766_v24 = vmov 1065369472  }
 0xefe   :  { %v615_v27 = vpop.f32.mrb[14].mxu1  ;;  %v2667_v13 = vld [vmem:[%s3315_s6 + $0x20] sm:$0xff]  }
 0xeff   :  { %v2157_v28 = vmul.f32 -1.442695, %v618_v26  ;;  %v2487_v29 = vpop.f32.mrb[15].mxu1  ;;  %v2668_v27 = vld [vmem:[%s3315_s6 + $0x28] sm:$0xff]  }
 0xf00   :  { %v2173_v29 = vld [vmem:[%s3316_s5 + $0x1] ss:$0 sm:$0xff] }
 0xf01   :  { %2743 = vpow2.f32 %v2157_v28 }
 0xf0b   :  { %v2744_v3 = vpop.eup %2743 }
 0xf0c   :  { %v622_v30 = vadd.f32 1.0, %v2744_v3 }
 0xf0e   :  { %2745 = vrcp.f32 %v622_v30 }
 0xf18   :  { %v2746_v31 = vpop.eup %2745 }
 0xf19   :  { %v625_v33 = vmul.f32 2.0, %v2746_v31  ;;  %v627_v7 = vmul.f32 %v2746_v31, %v555_v18 }
 0xf1b   :  { %v2158_v34 = vadd.f32 -1.0, %v625_v33  ;;  %v2670_v33 = vld [vmem:[%s3315_s6 + $0x38] sm:$0xff]  }
 0xf1d   :  { %629 = vrot.lane.b32.xlu0 %v2158_v34, %s2764_s3 }
 0xf8f   :  { %v630_v10 = vpop.permute.xlu0 %629 }
 0xf90   :  { %v632_v35 = vmul.f32 %v2746_v31, %v630_v10 }
 0xf92   :  { %634 = vrot.lane.b32.xlu1 %v632_v35, %s2765_s27 }
0x1004   :  { %v635_v36 = vpop.permute.xlu1 %634 }
0x1005   :  { %v637_v38 = vadd.f32 %v635_v36, %v627_v7 }
0x1007   :  { %2747 = vtanh.f32 %v637_v38 }
0x1011   :  { %v2748_v39 = vpop.eup %2747 }
0x1012   :  { %640 = vrot.lane.b32.xlu0 %v2748_v39, %s2764_s3  ;;  %v2671_v39 = vld [vmem:[%s3314_s4] sm:$0xff]  }
0x1084   :  { %v641_v40 = vpop.permute.xlu0 %640 }
0x1085   :  { %v643_v41 = vmul.f32 %v2746_v31, %v641_v40 }
0x1087   :  { %v2983_v42 = vpack.c.bf16 %v643_v41, %v643_v41 }
0x1089   :  { %655 = vrot.lane.b32.xlu1 %v2983_v42, %s2765_s27 }
0x10fb   :  { %v656_v43 = vpop.permute.xlu1 %655 }
0x10fc   :  { %2493 = vmatmul.mubr.msk.bf16.vlgmr.msra.gmra.mrb[16].mxu0 %vm164_vm3, %v656_v43  ;;  %v2672_v43 = vld [vmem:[%s3314_s4 + $0x8] sm:$0xff]  }
0x10fd   :  { %2508 = vmatprep.mubr.msk.bf16.mxu0 %vm2762_vm1, %v2761_v1  ;;  %2505 = vmatpush3.bf16.msra.mxu0 %v2665_v12 }
0x10fe   :  { %2506 = vmatprep.subr.bf16.mxu0 %v2761_v1 }
0x1101   :  { %2507 = vmatpush3.bf16.msra.mxu0 %v2666_v6 }
0x1102   :  { %2524 = vmatprep.subr.bf16.mxu0 %v2761_v1 }
0x1104   :  { %2509 = vmatmul.mubr.msk.bf16.vlgmr.msra.gmra.mrb[20].mxu0 %vm164_vm3, %v2766_v24 }
0x1105   :  { %2532 = vmatprep.mubr.msk.bf16.mxu0 %vm2762_vm1, %v2761_v1 }
0x11cf   :  { %v694_v45 = vpop.f32.mrb[16].mxu0 }
0x11d0   :  { %v700_v46 = vadd.f32 %v694_v45, %v133_v44  ;;  %v2494_v47 = vpop.f32.mrb[17].mxu0 }
0x11d1   :  { %v697_v48 = vpop.f32.mrb[18].mxu0 }
0x11d2   :  { %v2161_v16 = vmul.f32 -1.442695, %v700_v46  ;;  %v2495_v49 = vpop.f32.mrb[19].mxu0  ;;  %v2677_v48 = vld [vmem:[%s3317_s8 + $0x20] sm:$0xff]  }
0x11d3   :  { %2525 = vmatpush3.bf16.msra.mxu0 %v2677_v48  ;;  %v2680_v49 = vld [vmem:[%s3317_s8 + $0x38] sm:$0xff]  }
0x11d4   :  { %2749 = vpow2.f32 %v2161_v16  ;;  %2526 = vmatprep.subr.bf16.mxu0 %v2761_v1 }
0x11d7   :  { %v895_v3 = vpop.f32.mrb[20].mxu0 }
0x11d8   :  { %v896_v30 = vadd.f32 %v2173_v29, %v895_v3  ;;  %v2510_v31 = vpop.f32.mrb[21].mxu0  ;;  %v2687_v3 = vld [vmem:[%s3317_s8 + $0x10] sm:$0xff]  }
0x11d9   :  { %v898_v34 = vpop.f32.mrb[22].mxu0 }
0x11da   :  { %v901_v35 = vmax.f32 %v896_v30, 0.0  ;;  %v2511_v7 = vpop.f32.mrb[23].mxu0  ;;  %v2688_v30 = vld [vmem:[%s3317_s8 + $0x18] sm:$0xff]  }
0x11dc   :  { %v902_v36 = vpack.c.bf16 %v901_v35, %v901_v35 }
0x11de   :  { %v2750_v50 = vpop.eup %2749 }
0x11df   :  { %v704_v51 = vadd.f32 1.0, %v2750_v50 }
0x11e1   :  { %2751 = vrcp.f32 %v704_v51 }
0x11eb   :  { %v2752_v52 = vpop.eup %2751 }
0x11ec   :  { %v707_v53 = vmul.f32 2.0, %v2752_v52  ;;  %v709_v4 = vmul.f32 %v2752_v52, %v637_v38 }
0x11ee   :  { %v2162_v55 = vadd.f32 -1.0, %v707_v53 }
0x11f0   :  { %711 = vrot.lane.b32.xlu0 %v2162_v55, %s2764_s3 }
0x1262   :  { %v712_v56 = vpop.permute.xlu0 %711 }
0x1263   :  { %v714_v57 = vmul.f32 %v2752_v52, %v712_v56  ;;  %v2186_v56 = vld [vmem:[%s3318_s7 + $0x1] ss:$0 sm:$0xff] }
0x1265   :  { %716 = vrot.lane.b32.xlu1 %v714_v57, %s2765_s27 }
0x12d7   :  { %v717_v58 = vpop.permute.xlu1 %716 }
0x12d8   :  { %v719_v59 = vadd.f32 %v717_v58, %v709_v4 }
0x12da   :  { %2753 = vtanh.f32 %v719_v59 }
0x12e4   :  { %v2754_v60 = vpop.eup %2753 }
0x12e5   :  { %722 = vrot.lane.b32.xlu0 %v2754_v60, %s2764_s3 }
0x1357   :  { %v723_v61 = vpop.permute.xlu0 %722 }
0x1358   :  { %v725_v62 = vmul.f32 %v2752_v52, %v723_v61  ;;  %v2681_v52 = vld [vmem:[%s3315_s6] sm:$0xff]  }
0x135a   :  { %v726_v63 = vpack.c.bf16 %v725_v62, %v725_v62 }
0x135c   :  { %737 = vrot.lane.b32.xlu1 %v726_v63, %s2765_s27 }
0x13ce   :  { %v738_v0 = vpop.permute.xlu1 %737 }
0x13cf   :  { %2501 = vmatmul.mubr.msk.bf16.vlgmr.msra.gmra.mrb[16].mxu1 %vm164_vm3, %v738_v0  ;;  %v2683_v0 = vld [vmem:[%s3315_s6 + $0x10] sm:$0xff]  }
0x13d0   :  { %2520 = vmatprep.mubr.msk.bf16.mxu1 %vm2762_vm1, %v2761_v1  ;;  %2513 = vmatpush3.bf16.msra.mxu1 %v2667_v13 }
0x13d1   :  { %2514 = vmatprep.subr.bf16.mxu1 %v2761_v1 }
0x13d4   :  { %2515 = vmatpush3.bf16.msra.mxu1 %v2668_v27 }
0x13d5   :  { %2516 = vmatprep.subr.bf16.mxu1 %v2761_v1 }
0x14a2   :  { %v776_v9 = vpop.f32.mrb[16].mxu1 }
0x14a3   :  { %v782_v11 = vadd.f32 %v776_v9, %v136_v8  ;;  %v2502_v14 = vpop.f32.mrb[17].mxu1  ;;  %v2684_v8 = vld [vmem:[%s3315_s6 + $0x18] sm:$0xff]  }
0x14a4   :  { %v779_v15 = vpop.f32.mrb[18].mxu1  ;;  %v2685_v14 = vld [vmem:[%s3317_s8] sm:$0xff]  }
0x14a5   :  { %v2165_v5 = vmul.f32 -1.442695, %v782_v11  ;;  %v2503_v17 = vpop.f32.mrb[19].mxu1  ;;  %v2686_v15 = vld [vmem:[%s3317_s8 + $0x8] sm:$0xff]  }
0x14a7   :  { %2755 = vpow2.f32 %v2165_v5  ;;  %v2207_v5 = vld [vmem:[%s3316_s5] ss:$0 sm:$0xff] }
0x14b1   :  { %v2756_v18 = vpop.eup %2755 }
0x14b2   :  { %v786_v19 = vadd.f32 1.0, %v2756_v18 }
0x14b4   :  { %2757 = vrcp.f32 %v786_v19 }
0x14be   :  { %v3001_v20 = vpop.eup %2757 }
0x14bf   :  { %v789_v21 = vmul.f32 2.0, %v3001_v20 }
0x14c1   :  { %v2166_v23 = vadd.f32 -1.0, %v789_v21 }
0x14c3   :  { %793 = vrot.lane.b32.xlu0 %v2166_v23, %s2764_s3 }
0x1535   :  { %v794_v25 = vpop.permute.xlu0 %793 }
0x1536   :  { %v796_v26 = vmul.f32 %v3001_v20, %v794_v25 }
0x1538   :  { %798 = vrot.lane.b32.xlu1 %v796_v26, %s2765_s27 }
0x153c   :  { %238 = vrot.lane.b32.xlu1 %v2880_v37, %s2765_s27  ;;  %v791_v37 = vmul.f32 %v3001_v20, %v719_v59 }
0x1540   :  { %402 = vrot.lane.b32.xlu1 %v2935_v32, %s2765_s27  ;;  %v2669_v32 = vld [vmem:[%s3315_s6 + $0x30] sm:$0xff]  }
0x1541   :  { %2517 = vmatpush3.bf16.msra.mxu1 %v2669_v32 }
0x1542   :  { %2518 = vmatprep.subr.bf16.mxu1 %v2761_v1 }
0x1544   :  { %566 = vrot.lane.b32.xlu1 %v2967_v22, %s2765_s27 }
0x1545   :  { %2519 = vmatpush3.bf16.msra.mxu1 %v2670_v33 }
0x1546   :  { %2536 = vmatprep.subr.bf16.mxu1 %v2671_v39 }
0x1548   :  { %730 = vrot.lane.b32.xlu1 %v726_v63, %s2765_s27  ;;  %2521 = vmatmul.mubr.msk.bf16.vlgmr.msra.gmra.mrb[20].mxu1 %vm944_vm5, %v902_v36  ;;  %v2682_v63 = vld [vmem:[%s3315_s6 + $0x8] sm:$0xff]  }
0x1549   :  { %2537 = vmatpush3.bf16.msra.mxu1 %v2671_v39 }
0x154a   :  { %2538 = vmatprep.subr.bf16.mxu1 %v2672_v43 }
0x154d   :  { %2539 = vmatpush3.bf16.msra.mxu1 %v2672_v43 }
0x154e   :  { %2564 = vmatprep.subr.bf16.mxu1 %v2685_v14 }
0x15aa   :  { %v799_v22 = vpop.permute.xlu1 %798 }
0x15ab   :  { %v801_v28 = vadd.f32 %v799_v22, %v791_v37 }
0x15ad   :  { %2759 = vtanh.f32 %v801_v28 }
0x15ae   :  { %v239_v10 = vpop.permute.xlu1 %238 }
0x15af   :  { %242 = vst.msk [vmem:[#allocation3] sm:$0xf] %vm241_vm4, %v239_v10 }
0x15b2   :  { %v403_v38 = vpop.permute.xlu1 %402 }
0x15b3   :  { %406 = vst.msk [vmem:[#allocation3 + $0x8] sm:$0xf] %vm241_vm4, %v403_v38 }
0x15b6   :  { %v567_v40 = vpop.permute.xlu1 %566 }
0x15b7   :  { %v2760_v41 = vpop.eup %2759  ;;  %570 = vst.msk [vmem:[#allocation3 + $0x10] sm:$0xf] %vm241_vm4, %v567_v40 }
0x15b8   :  { %804 = vrot.lane.b32.xlu0 %v2760_v41, %s2764_s3 }
0x15ba   :  { %v731_v44 = vpop.permute.xlu1 %730 }
0x15bb   :  { %734 = vst.msk [vmem:[#allocation3 + $0x18] sm:$0xf] %vm241_vm4, %v731_v44 }
0x15bc   :  { %320 = vrot.lane.b32.xlu0 %v2911_v2, %s2765_s27  ;;  %v2678_v2 = vld [vmem:[%s3317_s8 + $0x28] sm:$0xff]  }
0x15bd   :  { %2527 = vmatpush3.bf16.msra.mxu0 %v2678_v2 }
0x15be   :  { %2528 = vmatprep.subr.bf16.mxu0 %v2761_v1 }
0x15c0   :  { %484 = vrot.lane.b32.xlu0 %v2951_v54, %s2765_s27  ;;  %v2679_v54 = vld [vmem:[%s3317_s8 + $0x30] sm:$0xff]  }
0x15c1   :  { %2529 = vmatpush3.bf16.msra.mxu0 %v2679_v54 }
0x15c2   :  { %2530 = vmatprep.subr.bf16.mxu0 %v2761_v1 }
0x15c4   :  { %648 = vrot.lane.b32.xlu0 %v2983_v42, %s2765_s27 }
0x15c5   :  { %2531 = vmatpush3.bf16.msra.mxu0 %v2680_v49 }
0x15c6   :  { %2548 = vmatprep.subr.bf16.mxu0 %v2681_v52 }
0x161b   :  { %v982_v57 = vpop.f32.mrb[20].mxu1 }
0x161c   :  { %v983_v4 = vadd.f32 %v2186_v56, %v982_v57  ;;  %v2522_v58 = vpop.f32.mrb[21].mxu1 }
0x161d   :  { %v985_v59 = vpop.f32.mrb[22].mxu1 }
0x161e   :  { %v988_v60 = vmax.f32 %v983_v4, 0.0  ;;  %v2523_v61 = vpop.f32.mrb[23].mxu1 }
0x1620   :  { %v989_v62 = vpack.c.bf16 %v988_v60, %v988_v60 }
0x1622   :  { %2533 = vmatmul.mubr.msk.bf16.vlgmr.msra.gmra.mrb[24].mxu0 %vm944_vm5, %v989_v62 }
0x1623   :  { %2549 = vmatpush3.bf16.msra.mxu0 %v2681_v52 }
0x1624   :  { %2550 = vmatprep.subr.bf16.mxu0 %v2682_v63 }
0x1627   :  { %2551 = vmatpush3.bf16.msra.mxu0 %v2682_v63 }
0x1628   :  { %2552 = vmatprep.subr.bf16.mxu0 %v2683_v0 }
0x162a   :  { %v805_v45 = vpop.permute.xlu0 %804 }
0x162b   :  { %v807_v46 = vmul.f32 %v3001_v20, %v805_v45  ;;  %2553 = vmatpush3.bf16.msra.mxu0 %v2683_v0 }
0x162c   :  { %2554 = vmatprep.subr.bf16.mxu0 %v2684_v8 }
0x162d   :  { %v2330_v47 = vpack.c.bf16 %v807_v46, %v807_v46  ;;  %v2218_v46 = vld [vmem:[%s3318_s7] ss:$0 sm:$0xff] }
0x162e   :  { %v321_v16 = vpop.permute.xlu0 %320 }
0x162f   :  { %324 = vst.msk [vmem:[#allocation3 + $0x4] sm:$0xf] %vm241_vm4, %v321_v16  ;;  %812 = vrot.lane.b32.xlu0 %v2330_v47, %s2765_s27  ;;  %2555 = vmatpush3.bf16.msra.mxu0 %v2684_v8 }
0x1630   :  { %2580 = vmatprep.subr.bf16.mxu0 %v2761_v1 }
0x1632   :  { %v485_v42 = vpop.permute.xlu0 %484 }
0x1633   :  { %488 = vst.msk [vmem:[#allocation3 + $0xc] sm:$0xf] %vm241_vm4, %v485_v42 }
0x1636   :  { %v649_v50 = vpop.permute.xlu0 %648  ;;  %v3080_v51 = vld [vmem:[#allocation3] sm:$0xff]  }
0x1637   :  { %652 = vst.msk [vmem:[#allocation3 + $0x14] sm:$0xf] %vm241_vm4, %v649_v50  ;;  %2540 = vmatprep.mubr.msk.bf16.mxu1 %vm164_vm3, %v3080_v51 }
0x163a   :  { %v3089_v53 = vld [vmem:[#allocation3 + $0x8] sm:$0xff]  }
0x163b   :  { %2541 = vmatmul.mubr.msk.bf16.vlgmr.msra.gmra.mrb[24].mxu1 %vm164_vm3, %v3089_v53 }
0x163c   :  { %2565 = vmatpush3.bf16.msra.mxu1 %v2685_v14 }
0x163d   :  { %2566 = vmatprep.subr.bf16.mxu1 %v2686_v15 }
0x163e   :  { %v3093_v55 = vld [vmem:[#allocation3 + $0x10] sm:$0xff]  }
0x163f   :  { %2544 = vmatprep.mubr.msk.bf16.mxu1 %vm164_vm3, %v3093_v55 }
0x1640   :  { %2567 = vmatpush3.bf16.msra.mxu1 %v2686_v15 }
0x1641   :  { %2568 = vmatprep.subr.bf16.mxu1 %v2687_v3 }
0x1644   :  { %2569 = vmatpush3.bf16.msra.mxu1 %v2687_v3 }
0x1645   :  { %2570 = vmatprep.subr.bf16.mxu1 %v2688_v30 }
0x1648   :  { %2571 = vmatpush3.bf16.msra.mxu1 %v2688_v30  ;;  %v825_v30 = vunpack.c.l.bf16 %v3080_v51 }
0x1649   :  { %2588 = vmatprep.subr.bf16.mxu1 %v2761_v1 }
0x16a1   :  { %v813_v9 = vpop.permute.xlu0 %812 }
0x16a2   :  { %816 = vst.msk [vmem:[#allocation3 + $0x1c] sm:$0xf] %vm241_vm4, %v813_v9 }
0x16a9   :  { %v3112_v11 = vld [vmem:[#allocation3 + $0x18] sm:$0xff]  }
0x16aa   :  { %2545 = vmatmul.mubr.msk.bf16.gmra.mrb[28].mxu1 %vm164_vm3, %v3112_v11 }
0x16f5   :  { %v3127_v32 = vpop.f32.mrb[24].mxu0 }
0x16f6   :  { %v2534_v22 = vpop.f32.mrb[25].mxu0 }
0x16f7   :  { %v1071_v28 = vpop.f32.mrb[26].mxu0  ;;  %v827_v22 = vunpack.c.l.bf16 %v3089_v53 }
0x16f8   :  { %v2535_v29 = vpop.f32.mrb[27].mxu0 }
0x170e   :  { %v2542_v17 = vpop.f32.mrb[24].mxu1 }
0x170f   :  { %v1172_v18 = vadd.f32 %v2542_v17, %v2207_v5  ;;  %v1163_v19 = vpop.f32.mrb[25].mxu1 }
0x1710   :  { %v1164_v20 = vadd.f32 %v2207_v5, %v1163_v19  ;;  %v2543_v21 = vpop.f32.mrb[26].mxu1 }
0x1711   :  { %v1175_v23 = vadd.f32 %v2543_v21, %v2207_v5  ;;  %v1166_v12 = vpop.f32.mrb[27].mxu1  ;;  %v1196_v24 = vmax.f32 %v1172_v18, 0.0  ;;  %v2689_v21 = vld [vmem:[%s3314_s4 + $0x30] sm:$0xff]  }
0x1712   :  { %v1167_v6 = vadd.f32 %v2207_v5, %v1166_v12  ;;  %v1194_v26 = vmax.f32 %v1164_v20, 0.0  ;;  %v2227_v12 = vld [vmem:[%s3319_s9] ss:$0 sm:$0xff] }
0x1713   :  { %v1197_v25 = vmax.f32 %v1175_v23, 0.0  ;;  %v2201_v23 = vld [vmem:[%s3319_s9 + $0x1] ss:$0 sm:$0xff] }
0x1714   :  { %v1195_v13 = vmax.f32 %v1167_v6, 0.0  ;;  %v2690_v6 = vld [vmem:[%s3314_s4 + $0x38] sm:$0xff]  }
0x1715   :  { %v1203_v27 = vpack.c.bf16 %v1197_v25, %v1196_v24  ;;  %v1069_v25 = vadd.f32 %v2201_v23, %v3127_v32  ;;  %v2691_v32 = vld [vmem:[%s3315_s6 + $0x60] sm:$0xff]  }
0x1716   :  { %v1202_v37 = vpack.c.bf16 %v1195_v13, %v1194_v26 }
0x1718   :  { %2556 = vmatprep.mubr.msk.bf16.mxu0 %vm944_vm5, %v1202_v37 }
0x1719   :  { %2557 = vmatmul.mubr.msk.bf16.vlgmr.msra.gmra.mrb[28].mxu0 %vm944_vm5, %v1203_v27 }
0x171a   :  { %2581 = vmatpush3.bf16.msra.mxu0 %v2689_v21 }
0x171b   :  { %2582 = vmatprep.subr.bf16.mxu0 %v2761_v1 }
0x171e   :  { %2583 = vmatpush3.bf16.msra.mxu0 %v2690_v6 }
0x171f   :  { %2600 = vmatprep.subr.bf16.mxu0 %v2761_v1 }
0x177d   :  { %v2546_v31 = vpop.f32.mrb[28].mxu1 }
0x177e   :  { %v1188_v33 = vadd.f32 %v2546_v31, %v2207_v5  ;;  %v1179_v34 = vpop.f32.mrb[29].mxu1 }
0x177f   :  { %v1180_v10 = vadd.f32 %v2207_v5, %v1179_v34  ;;  %v2547_v35 = vpop.f32.mrb[30].mxu1 }
0x1780   :  { %v1191_v7 = vadd.f32 %v2547_v35, %v2207_v5  ;;  %v1182_v36 = vpop.f32.mrb[31].mxu1  ;;  %v1200_v39 = vmax.f32 %v1188_v33, 0.0 }
0x1781   :  { %v1183_v38 = vadd.f32 %v2207_v5, %v1182_v36  ;;  %v1198_v41 = vmax.f32 %v1180_v10, 0.0  ;;  %v828_v10 = vunpack.c.h.bf16 %v3089_v53  ;;  %v826_v36 = vunpack.c.h.bf16 %v3080_v51  ;;  %v2693_v51 = vld [vmem:[%s3315_s6 + $0x70] sm:$0xff]  }
0x1782   :  { %v1201_v40 = vmax.f32 %v1191_v7, 0.0 }
0x1783   :  { %v1199_v43 = vmax.f32 %v1183_v38, 0.0 }
0x1784   :  { %v1205_v44 = vpack.c.bf16 %v1201_v40, %v1200_v39  ;;  %v2692_v39 = vld [vmem:[%s3315_s6 + $0x68] sm:$0xff]  }
0x1785   :  { %v1204_v45 = vpack.c.bf16 %v1199_v43, %v1198_v41 }
0x1787   :  { %2560 = vmatprep.mubr.msk.bf16.mxu0 %vm944_vm5, %v1204_v45 }
0x1788   :  { %2561 = vmatmul.mubr.msk.bf16.gmra.mrb[32].mxu0 %vm944_vm5, %v1205_v44 }
0x1789   :  { %2584 = vmatprep.mubr.msk.bf16.mxu0 %vm2762_vm1, %v2761_v1 }
0x17ec   :  { %v2558_v47 = vpop.f32.mrb[28].mxu0 }
0x17ed   :  { %v1300_v48 = vadd.f32 %v2558_v47, %v2218_v46  ;;  %v1291_v16 = vpop.f32.mrb[29].mxu0 }
0x17ee   :  { %v1292_v2 = vadd.f32 %v2218_v46, %v1291_v16  ;;  %v2559_v54 = vpop.f32.mrb[30].mxu0 }
0x17ef   :  { %v1303_v42 = vadd.f32 %v2559_v54, %v2218_v46  ;;  %v1294_v49 = vpop.f32.mrb[31].mxu0  ;;  %v1324_v52 = vmax.f32 %v1300_v48, 0.0  ;;  %v829_v54 = vunpack.c.l.bf16 %v3093_v55 }
0x17f0   :  { %v1295_v50 = vadd.f32 %v2218_v46, %v1294_v49  ;;  %v1322_v57 = vmax.f32 %v1292_v2, 0.0 }
0x17f1   :  { %v1325_v56 = vmax.f32 %v1303_v42, 0.0 }
0x17f2   :  { %v1323_v4 = vmax.f32 %v1295_v50, 0.0  ;;  %v831_v50 = vunpack.c.l.bf16 %v3112_v11 }
0x17f3   :  { %v1331_v58 = vpack.c.bf16 %v1325_v56, %v1324_v52 }
0x17f4   :  { %v1330_v59 = vpack.c.bf16 %v1323_v4, %v1322_v57  ;;  %v830_v57 = vunpack.c.h.bf16 %v3093_v55 }
0x17f6   :  { %2572 = vmatprep.mubr.msk.bf16.mxu1 %vm944_vm5, %v1330_v59 }
0x17f7   :  { %2573 = vmatmul.mubr.msk.bf16.vlgmr.msra.gmra.mrb[32].mxu1 %vm944_vm5, %v1331_v58 }
0x17f8   :  { %2589 = vmatpush3.bf16.msra.mxu1 %v2691_v32  ;;  %v2697_v32 = vld [vmem:[%s3317_s8 + $0x60] sm:$0xff]  }
0x17f9   :  { %2590 = vmatprep.subr.bf16.mxu1 %v2761_v1 }
0x17fc   :  { %2591 = vmatpush3.bf16.msra.mxu1 %v2692_v39 }
0x17fd   :  { %2592 = vmatprep.subr.bf16.mxu1 %v2761_v1 }
0x1800   :  { %2593 = vmatpush3.bf16.msra.mxu1 %v2693_v51  ;;  %v2696_v51 = vld [vmem:[%s3314_s4 + $0x28] sm:$0xff]  }
0x1801   :  { %2594 = vmatprep.subr.bf16.mxu1 %v2761_v1 }
0x185b   :  { %v2562_v60 = vpop.f32.mrb[32].mxu0 }
0x185c   :  { %v1316_v61 = vadd.f32 %v2562_v60, %v2218_v46  ;;  %v1307_v62 = vpop.f32.mrb[33].mxu0  ;;  %v832_v60 = vunpack.c.h.bf16 %v3112_v11 }
0x185d   :  { %v1308_v63 = vadd.f32 %v2218_v46, %v1307_v62  ;;  %v2563_v0 = vpop.f32.mrb[34].mxu0 }
0x185e   :  { %v1319_v8 = vadd.f32 %v2563_v0, %v2218_v46  ;;  %v1310_v9 = vpop.f32.mrb[35].mxu0  ;;  %v1328_v15 = vmax.f32 %v1316_v61, 0.0 }
0x185f   :  { %v1311_v14 = vadd.f32 %v2218_v46, %v1310_v9  ;;  %v1326_v17 = vmax.f32 %v1308_v63, 0.0 }
0x1860   :  { %v1329_v5 = vmax.f32 %v1319_v8, 0.0 }
0x1861   :  { %v1327_v18 = vmax.f32 %v1311_v14, 0.0 }
0x1862   :  { %v1333_v19 = vpack.c.bf16 %v1329_v5, %v1328_v15 }
0x1863   :  { %v1332_v20 = vpack.c.bf16 %v1327_v18, %v1326_v17 }
0x1865   :  { %2576 = vmatprep.mubr.msk.bf16.mxu1 %vm944_vm5, %v1332_v20 }
0x1866   :  { %2577 = vmatmul.mubr.msk.bf16.gmra.mrb[36].mxu1 %vm944_vm5, %v1333_v19 }
0x1867   :  { %2596 = vmatprep.mubr.msk.bf16.mxu1 %vm2762_vm1, %v2761_v1 }
0x18ca   :  { %v2574_v24 = vpop.f32.mrb[32].mxu1 }
0x18cb   :  { %v1428_v26 = vadd.f32 %v2574_v24, %v2227_v12  ;;  %v1419_v13 = vpop.f32.mrb[33].mxu1 }
0x18cc   :  { %v1420_v27 = vadd.f32 %v2227_v12, %v1419_v13  ;;  %v2575_v37 = vpop.f32.mrb[34].mxu1 }
0x18cd   :  { %v1452_v28 = vmul.f32 %v1428_v26, %v1069_v25  ;;  %v1431_v29 = vadd.f32 %v2575_v37, %v2227_v12  ;;  %v1422_v3 = vpop.f32.mrb[35].mxu1 }
0x18ce   :  { %v1450_v31 = vmul.f32 %v1420_v27, %v1069_v25  ;;  %v1423_v33 = vadd.f32 %v2227_v12, %v1422_v3 }
0x18cf   :  { %v1475_v34 = vadd.f32 %v1452_v28, %v827_v22  ;;  %v1453_v35 = vmul.f32 %v1431_v29, %v1069_v25  ;;  %v1460_v58 = vsel %vm164_vm3, %v1452_v28, -inf }
0x18d0   :  { %v1473_v7 = vadd.f32 %v1450_v31, %v825_v30  ;;  %v1451_v38 = vmul.f32 %v1423_v33, %v1069_v25  ;;  %v1458_v62 = vsel %vm164_vm3, %v1450_v31, -inf  ;;  %v2694_v31 = vld [vmem:[%s3315_s6 + $0x78] sm:$0xff]   ;;  %v2695_v33 = vld [vmem:[%s3314_s4 + $0x20] sm:$0xff]  }
0x18d1   :  { %v1476_v40 = vadd.f32 %v1453_v35, %v828_v10  ;;  %v3175_v43 = vmul.f32 0.5, %v1475_v34  ;;  %v1461_v55 = vsel %vm164_vm3, %v1453_v35, -inf  ;;  %2595 = vmatpush3.bf16.msra.mxu1 %v2694_v31  ;;  %v2698_v34 = vld [vmem:[%s3317_s8 + $0x68] sm:$0xff]   ;;  %v2241_v10 = vld [vmem:[%s3316_s5 + $0x3] ss:$0 sm:$0xff] }
0x18d2   :  { %v1474_v41 = vadd.f32 %v1451_v38, %v826_v36  ;;  %v3179_v45 = vmul.f32 0.5, %v1473_v7  ;;  %v1459_v11 = vsel %vm164_vm3, %v1451_v38, -inf  ;;  %2612 = vmatprep.subr.bf16.mxu1 %v2695_v33 }
0x18d3   :  { %v3177_v44 = vmul.f32 0.5, %v1476_v40 }
0x18d4   :  { %v3181_v53 = vmul.f32 0.5, %v1474_v41 }
0x18d5   :  { %v1733_v46 = vpack.c.bf16 %v3177_v44, %v3175_v43  ;;  %v2701_v43 = vld [vmem:[%s3317_s8 + $0x78] sm:$0xff]   ;;  %v2702_v44 = vld [vmem:[%s3315_s6 + $0x48] sm:$0xff]  }
0x18d6   :  { %v1732_v47 = vpack.c.bf16 %v3181_v53, %v3179_v45  ;;  %v2700_v45 = vld [vmem:[%s3315_s6 + $0x40] sm:$0xff]   ;;  %v2703_v53 = vld [vmem:[%s3315_s6 + $0x50] sm:$0xff]  }
0x1939   :  { %v2578_v48 = vpop.f32.mrb[36].mxu1 }
0x193a   :  { %v1444_v16 = vadd.f32 %v2578_v48, %v2227_v12  ;;  %v1435_v2 = vpop.f32.mrb[37].mxu1  ;;  %v2699_v48 = vld [vmem:[%s3317_s8 + $0x70] sm:$0xff]  }
0x193b   :  { %v1436_v42 = vadd.f32 %v2227_v12, %v1435_v2  ;;  %v2579_v49 = vpop.f32.mrb[38].mxu1 }
0x193c   :  { %v1456_v52 = vmul.f32 %v1444_v16, %v1069_v25  ;;  %v1447_v56 = vadd.f32 %v2579_v49, %v2227_v12  ;;  %v1438_v4 = vpop.f32.mrb[39].mxu1 }
0x193d   :  { %v1454_v59 = vmul.f32 %v1436_v42, %v1069_v25  ;;  %v1439_v61 = vadd.f32 %v2227_v12, %v1438_v4 }
0x193e   :  { %v1466_v63 = vsel %vm164_vm3, %v1456_v52, -inf  ;;  %v1479_v0 = vadd.f32 %v1456_v52, %v831_v50  ;;  %v1457_v8 = vmul.f32 %v1447_v56, %v1069_v25  ;;  %v2280_v52 = vld [vmem:[%s3316_s5 + $0x2] ss:$0 sm:$0xff] }
0x193f   :  { %v1467_v9 = vmax.f32 %v1460_v58, %v1466_v63  ;;  %v1462_v14 = vsel %vm164_vm3, %v1454_v59, -inf  ;;  %v1477_v15 = vadd.f32 %v1454_v59, %v829_v54  ;;  %v1455_v5 = vmul.f32 %v1439_v61, %v1069_v25 }
0x1940   :  { %v1463_v17 = vmax.f32 %v1458_v62, %v1462_v14  ;;  %v1468_v18 = vsel %vm164_vm3, %v1457_v8, -inf  ;;  %v1480_v19 = vadd.f32 %v1457_v8, %v832_v60  ;;  %v1487_v12 = vmul.f32 0.5, %v1479_v0 }
0x1941   :  { %v1469_v20 = vmax.f32 %v1461_v55, %v1468_v18  ;;  %v1464_v21 = vsel %vm164_vm3, %v1455_v5, -inf  ;;  %v1478_v23 = vadd.f32 %v1455_v5, %v830_v57  ;;  %v1485_v26 = vmul.f32 0.5, %v1477_v15 }
0x1942   :  { %v1488_v6 = vmul.f32 0.5, %v1480_v19  ;;  %v1465_v24 = vmax.f32 %v1459_v11, %v1464_v21 }
0x1943   :  { %v1471_v13 = vmax.f32 %v1467_v9, %v1469_v20  ;;  %v1486_v27 = vmul.f32 0.5, %v1478_v23 }
0x1944   :  { %v1735_v37 = vpack.c.bf16 %v1488_v6, %v1487_v12  ;;  %v1470_v25 = vmax.f32 %v1463_v17, %v1465_v24 }
0x1945   :  { %v1734_v22 = vpack.c.bf16 %v1486_v27, %v1485_v26  ;;  %v2705_v27 = vld [vmem:[%s3317_s8 + $0x40] sm:$0xff]  }
0x1946   :  { %v1472_v28 = vmax.f32 %v1470_v25, %v1471_v13  ;;  %v2707_v25 = vld [vmem:[%s3317_s8 + $0x50] sm:$0xff]  }
0x1948   :  { %v1489_v29 = vadd.f32 1.0, %v1472_v28 }
0x194a   :  { %v3204_v3 = vmul.f32 0.5, %v1489_v29 }
0x194c   :  { %v1491_v30 = vpack.c.bf16 %v3204_v3, %v3204_v3 }
0x194e   :  { %2585 = vmatmul.mubr.msk.bf16.vlgmr.msra.gmra.mrb[36].mxu0 %vm164_vm3, %v1491_v30 }
0x194f   :  { %2608 = vmatprep.mubr.msk.bf16.mxu0 %vm2762_vm1, %v2761_v1  ;;  %2601 = vmatpush3.bf16.msra.mxu0 %v2697_v32 }
0x1950   :  { %2602 = vmatprep.subr.bf16.mxu0 %v2761_v1 }
0x1953   :  { %2603 = vmatpush3.bf16.msra.mxu0 %v2698_v34 }
0x1954   :  { %2604 = vmatprep.subr.bf16.mxu0 %v2761_v1 }
0x1957   :  { %2605 = vmatpush3.bf16.msra.mxu0 %v2699_v48 }
0x1958   :  { %2606 = vmatprep.subr.bf16.mxu0 %v2761_v1  ;;  %v2704_v1 = vld [vmem:[%s3315_s6 + $0x58] sm:$0xff]  }
0x195b   :  { %2607 = vmatpush3.bf16.msra.mxu0 %v2701_v43 }
0x195c   :  { %2640 = vmatprep.subr.bf16.mxu0 %v2705_v27 }
0x1a21   :  { %v1554_v35 = vpop.f32.mrb[36].mxu0 }
0x1a22   :  { %v1555_v7 = vadd.f32 %v2241_v10, %v1554_v35  ;;  %v2586_v36 = vpop.f32.mrb[37].mxu0 }
0x1a23   :  { %v1557_v38 = vpop.f32.mrb[38].mxu0 }
0x1a24   :  { %v1560_v39 = vmax.f32 %v1555_v7, 0.0  ;;  %v2587_v40 = vpop.f32.mrb[39].mxu0 }
0x1a26   :  { %v1561_v41 = vpack.c.bf16 %v1560_v39, %v1560_v39 }
0x1a28   :  { %2597 = vmatmul.mubr.msk.bf16.vlgmr.msra.gmra.mrb[40].mxu1 %vm944_vm5, %v1561_v41 }
0x1a29   :  { %2613 = vmatpush3.bf16.msra.mxu1 %v2695_v33  ;;  %2616 = vmatprep.mubr.msk.bf16.mxu1 %vm164_vm3, %v1732_v47  ;;  %v2296_v33 = vld [vmem:[%s3318_s7 + $0x2] ss:$0 sm:$0xff] }
0x1a2a   :  { %2614 = vmatprep.subr.bf16.mxu1 %v2696_v51 }
0x1a2d   :  { %2615 = vmatpush3.bf16.msra.mxu1 %v2696_v51 }
0x1a2e   :  { %2624 = vmatprep.subr.bf16.mxu1 %v2700_v45 }
0x1a30   :  { %2617 = vmatmul.mubr.msk.bf16.vlgmr.msra.gmra.mrb[44].mxu1 %vm164_vm3, %v1733_v46  ;;  %v2254_v46 = vld [vmem:[%s3318_s7 + $0x3] ss:$0 sm:$0xff] }
0x1a31   :  { %2620 = vmatprep.mubr.msk.bf16.mxu1 %vm164_vm3, %v1734_v22  ;;  %2625 = vmatpush3.bf16.msra.mxu1 %v2700_v45  ;;  %v2708_v22 = vld [vmem:[%s3317_s8 + $0x58] sm:$0xff]  }
0x1a32   :  { %2626 = vmatprep.subr.bf16.mxu1 %v2702_v44 }
0x1a35   :  { %2627 = vmatpush3.bf16.msra.mxu1 %v2702_v44 }
0x1a36   :  { %2628 = vmatprep.subr.bf16.mxu1 %v2703_v53 }
0x1a38   :  { %2621 = vmatmul.mubr.msk.bf16.gmra.mrb[48].mxu1 %vm164_vm3, %v1735_v37  ;;  %v2706_v37 = vld [vmem:[%s3317_s8 + $0x48] sm:$0xff]  }
0x1a39   :  { %2629 = vmatpush3.bf16.msra.mxu1 %v2703_v53 }
0x1a3a   :  { %2630 = vmatprep.subr.bf16.mxu1 %v2704_v1 }
0x1a3d   :  { %2631 = vmatpush3.bf16.msra.mxu1 %v2704_v1 }
0x1afb   :  { %v1640_v47 = vpop.f32.mrb[40].mxu1 }
0x1afc   :  { %v1641_v16 = vadd.f32 %v2254_v46, %v1640_v47  ;;  %v2598_v2 = vpop.f32.mrb[41].mxu1 }
0x1afd   :  { %v1643_v54 = vpop.f32.mrb[42].mxu1 }
0x1afe   :  { %v1646_v42 = vmax.f32 %v1641_v16, 0.0  ;;  %v2599_v49 = vpop.f32.mrb[43].mxu1 }
0x1b00   :  { %v1647_v50 = vpack.c.bf16 %v1646_v42, %v1646_v42 }
0x1b02   :  { %2609 = vmatmul.mubr.msk.bf16.vlgmr.msra.gmra.mrb[40].mxu0 %vm944_vm5, %v1647_v50 }
0x1b03   :  { %v2618_v56 = vpop.f32.mrb[44].mxu1  ;;  %2641 = vmatpush3.bf16.msra.mxu0 %v2705_v27 }
0x1b04   :  { %v1816_v57 = vadd.f32 %v2618_v56, %v2280_v52  ;;  %v1807_v4 = vpop.f32.mrb[45].mxu1  ;;  %2642 = vmatprep.subr.bf16.mxu0 %v2706_v37 }
0x1b05   :  { %v1808_v58 = vadd.f32 %v2280_v52, %v1807_v4  ;;  %v2619_v59 = vpop.f32.mrb[46].mxu1  ;;  %v2314_v4 = vld [vmem:[%s3319_s9 + $0x2] ss:$0 sm:$0xff] }
0x1b06   :  { %v1819_v60 = vadd.f32 %v2619_v59, %v2280_v52  ;;  %v1810_v61 = vpop.f32.mrb[47].mxu1  ;;  %v1840_v63 = vmax.f32 %v1816_v57, 0.0 }
0x1b07   :  { %v1811_v62 = vadd.f32 %v2280_v52, %v1810_v61  ;;  %v1838_v8 = vmax.f32 %v1808_v58, 0.0  ;;  %2643 = vmatpush3.bf16.msra.mxu0 %v2706_v37  ;;  %v2269_v58 = vld [vmem:[%s3319_s9 + $0x3] ss:$0 sm:$0xff] }
0x1b08   :  { %v1841_v0 = vmax.f32 %v1819_v60, 0.0  ;;  %2644 = vmatprep.subr.bf16.mxu0 %v2707_v25 }
0x1b09   :  { %v1839_v9 = vmax.f32 %v1811_v62, 0.0 }
0x1b0a   :  { %v1847_v14 = vpack.c.bf16 %v1841_v0, %v1840_v63 }
0x1b0b   :  { %v1846_v15 = vpack.c.bf16 %v1839_v9, %v1838_v8  ;;  %v2622_v5 = vpop.f32.mrb[48].mxu1  ;;  %2645 = vmatpush3.bf16.msra.mxu0 %v2707_v25 }
0x1b0c   :  { %v1832_v55 = vadd.f32 %v2622_v5, %v2280_v52  ;;  %v1823_v17 = vpop.f32.mrb[49].mxu1  ;;  %2646 = vmatprep.subr.bf16.mxu0 %v2708_v22 }
0x1b0d   :  { %v1824_v18 = vadd.f32 %v2280_v52, %v1823_v17  ;;  %v2623_v19 = vpop.f32.mrb[50].mxu1  ;;  %2632 = vmatprep.mubr.msk.bf16.mxu1 %vm944_vm5, %v1846_v15 }
0x1b0e   :  { %v1835_v11 = vadd.f32 %v2623_v19, %v2280_v52  ;;  %v1826_v20 = vpop.f32.mrb[51].mxu1  ;;  %2633 = vmatmul.mubr.msk.bf16.vlgmr.msra.gmra.mrb[52].mxu1 %vm944_vm5, %v1847_v14  ;;  %v1844_v23 = vmax.f32 %v1832_v55, 0.0 }
0x1b0f   :  { %v1827_v21 = vadd.f32 %v2280_v52, %v1826_v20  ;;  %v1842_v6 = vmax.f32 %v1824_v18, 0.0  ;;  %2647 = vmatpush3.bf16.msra.mxu0 %v2708_v22 }
0x1b10   :  { %v1845_v12 = vmax.f32 %v1835_v11, 0.0 }
0x1b11   :  { %v1843_v24 = vmax.f32 %v1827_v21, 0.0 }
0x1b12   :  { %v1849_v26 = vpack.c.bf16 %v1845_v12, %v1844_v23 }
0x1b13   :  { %v1848_v13 = vpack.c.bf16 %v1843_v24, %v1842_v6 }
0x1b15   :  { %2636 = vmatprep.mubr.msk.bf16.mxu1 %vm944_vm5, %v1848_v13 }
0x1b16   :  { %2637 = vmatmul.mubr.msk.bf16.gmra.mrb[56].mxu1 %vm944_vm5, %v1849_v26 }
0x1bd5   :  { %v1726_v28 = vpop.f32.mrb[40].mxu0 }
0x1bd6   :  { %v2610_v29 = vpop.f32.mrb[41].mxu0  ;;  %v1727_v60 = vadd.f32 %v2269_v58, %v1726_v28 }
0x1bd7   :  { %v1729_v30 = vpop.f32.mrb[42].mxu0 }
0x1bd8   :  { %v2611_v31 = vpop.f32.mrb[43].mxu0 }
0x1be1   :  { %v2634_v32 = vpop.f32.mrb[52].mxu1 }
0x1be2   :  { %v1946_v34 = vadd.f32 %v2634_v32, %v2296_v33  ;;  %v1937_v10 = vpop.f32.mrb[53].mxu1 }
0x1be3   :  { %v1938_v35 = vadd.f32 %v2296_v33, %v1937_v10  ;;  %v2635_v7 = vpop.f32.mrb[54].mxu1 }
0x1be4   :  { %v1949_v36 = vadd.f32 %v2635_v7, %v2296_v33  ;;  %v1940_v38 = vpop.f32.mrb[55].mxu1  ;;  %v1970_v40 = vmax.f32 %v1946_v34, 0.0 }
0x1be5   :  { %v1941_v39 = vadd.f32 %v2296_v33, %v1940_v38  ;;  %v1968_v51 = vmax.f32 %v1938_v35, 0.0  ;;  %v2121_v38 = vmul.f32 2.0, %v3204_v3 }
0x1be6   :  { %v1971_v41 = vmax.f32 %v1949_v36, 0.0 }
0x1be7   :  { %v1969_v48 = vmax.f32 %v1941_v39, 0.0 }
0x1be8   :  { %v1977_v45 = vpack.c.bf16 %v1971_v41, %v1970_v40 }
0x1be9   :  { %v1976_v43 = vpack.c.bf16 %v1969_v48, %v1968_v51  ;;  %v2638_v44 = vpop.f32.mrb[56].mxu1 }
0x1bea   :  { %v1962_v53 = vadd.f32 %v2638_v44, %v2296_v33  ;;  %v1953_v1 = vpop.f32.mrb[57].mxu1 }
0x1beb   :  { %v1954_v46 = vadd.f32 %v2296_v33, %v1953_v1  ;;  %v2639_v47 = vpop.f32.mrb[58].mxu1  ;;  %2648 = vmatprep.mubr.msk.bf16.mxu0 %vm944_vm5, %v1976_v43 }
0x1bec   :  { %v1965_v16 = vadd.f32 %v2639_v47, %v2296_v33  ;;  %v1956_v2 = vpop.f32.mrb[59].mxu1  ;;  %2649 = vmatmul.mubr.msk.bf16.vlgmr.msra.gmra.mrb[44].mxu0 %vm944_vm5, %v1977_v45  ;;  %v1974_v42 = vmax.f32 %v1962_v53, 0.0 }
0x1bed   :  { %v1957_v54 = vadd.f32 %v2296_v33, %v1956_v2  ;;  %v1972_v50 = vmax.f32 %v1954_v46, 0.0 }
0x1bee   :  { %v1975_v49 = vmax.f32 %v1965_v16, 0.0 }
0x1bef   :  { %v1973_v52 = vmax.f32 %v1957_v54, 0.0 }
0x1bf0   :  { %v1979_v56 = vpack.c.bf16 %v1975_v49, %v1974_v42 }
0x1bf1   :  { %v1978_v57 = vpack.c.bf16 %v1973_v52, %v1972_v50 }
0x1bf3   :  { %2652 = vmatprep.mubr.msk.bf16.mxu0 %vm944_vm5, %v1978_v57 }
0x1bf4   :  { %2653 = vmatmul.mubr.msk.bf16.gmra.mrb[48].mxu0 %vm944_vm5, %v1979_v56 }
0x1cbf   :  { %v2650_v59 = vpop.f32.mrb[44].mxu0 }
0x1cc0   :  { %v2076_v61 = vadd.f32 %v2650_v59, %v2314_v4  ;;  %v2067_v62 = vpop.f32.mrb[45].mxu0 }
0x1cc1   :  { %v2068_v63 = vadd.f32 %v2314_v4, %v2067_v62  ;;  %v2651_v0 = vpop.f32.mrb[46].mxu0 }
0x1cc2   :  { %v2100_v8 = vmul.f32 %v2076_v61, %v1727_v60  ;;  %v2079_v9 = vadd.f32 %v2651_v0, %v2314_v4  ;;  %v2070_v14 = vpop.f32.mrb[47].mxu0 }
0x1cc3   :  { %v2098_v15 = vmul.f32 %v2068_v63, %v1727_v60  ;;  %v2071_v5 = vadd.f32 %v2314_v4, %v2070_v14 }
0x1cc4   :  { %v2101_v55 = vmul.f32 %v2079_v9, %v1727_v60  ;;  %v2108_v13 = vsel %vm164_vm3, %v2100_v8, -inf }
0x1cc5   :  { %v2099_v17 = vmul.f32 %v2071_v5, %v1727_v60  ;;  %v2106_v25 = vsel %vm164_vm3, %v2098_v15, -inf }
0x1cc6   :  { %v2109_v30 = vsel %vm164_vm3, %v2101_v55, -inf }
0x1cc7   :  { %v2654_v18 = vpop.f32.mrb[48].mxu0  ;;  %v2107_v32 = vsel %vm164_vm3, %v2099_v17, -inf }
0x1cc8   :  { %v2092_v19 = vadd.f32 %v2654_v18, %v2314_v4  ;;  %v2083_v11 = vpop.f32.mrb[49].mxu0 }
0x1cc9   :  { %v2084_v20 = vadd.f32 %v2314_v4, %v2083_v11  ;;  %v2655_v21 = vpop.f32.mrb[50].mxu0 }
0x1cca   :  { %v2104_v23 = vmul.f32 %v2092_v19, %v1727_v60  ;;  %v2095_v12 = vadd.f32 %v2655_v21, %v2314_v4  ;;  %v2086_v6 = vpop.f32.mrb[51].mxu0 }
0x1ccb   :  { %v2102_v24 = vmul.f32 %v2084_v20, %v1727_v60  ;;  %v2087_v26 = vadd.f32 %v2314_v4, %v2086_v6 }
0x1ccc   :  { %v2114_v27 = vsel %vm164_vm3, %v2104_v23, -inf  ;;  %v2105_v37 = vmul.f32 %v2095_v12, %v1727_v60 }
0x1ccd   :  { %v2115_v22 = vmax.f32 %v2108_v13, %v2114_v27  ;;  %v2110_v28 = vsel %vm164_vm3, %v2102_v24, -inf  ;;  %v2103_v29 = vmul.f32 %v2087_v26, %v1727_v60 }
0x1cce   :  { %v2111_v31 = vmax.f32 %v2106_v25, %v2110_v28  ;;  %v2116_v33 = vsel %vm164_vm3, %v2105_v37, -inf }
0x1ccf   :  { %v2117_v34 = vmax.f32 %v2109_v30, %v2116_v33  ;;  %v2112_v10 = vsel %vm164_vm3, %v2103_v29, -inf }
0x1cd0   :  { %v2113_v35 = vmax.f32 %v2107_v32, %v2112_v10 }
0x1cd1   :  { %v2119_v7 = vmax.f32 %v2115_v22, %v2117_v34 }
0x1cd2   :  { %v2118_v36 = vmax.f32 %v2111_v31, %v2113_v35 }
0x1cd4   :  { %v2120_v39 = vmax.f32 %v2118_v36, %v2119_v7 }
0x1cd6   :  { %v2122_v40 = vadd.f32 %v2121_v38, %v2120_v39 }
0x1cd8   :  { %v2124_v41 = vmul.f32 0.33333334, %v2122_v40 }
0x1cda   :  { %2125 = vst.msk [vmem:[%s3320_s10] sm:$0xff] %vm164_vm3, %v2124_v41 }

</bundles_post_ra>
